<compile_context>
chip_gen: v5e
topology: v5e:2x2
jax: 0.10.0
libtpu: 0.0.40
codegen_flags: <defaults>
</compile_context>

<pallas_src>
import jax
import jax.numpy as jnp
from jax.experimental import pallas as pl
from jax.experimental.pallas import tpu as pltpu


# ----------------------------------------------------------------------------- kernel
def _ode_net_kernel(x_ref, p_ref, w2_ref, b3_ref, o_ref):
    x_row = x_ref[...]                                   # (1, TN) lane-dense
    p = p_ref[...]                                       # (H, 4) packed columns
    w1 = p[:, 0:1]                                       # (H, 1)
    b1 = p[:, 1:2]
    b2 = p[:, 2:3]
    w3 = p[:, 3:4]

    # Layer 1: rank-1 outer product -> VPU broadcast mul-add + EUP tanh.
    h = jnp.tanh(w1 * x_row + b1)                        # (H, TN)

    # Layer 2: the only real contraction, on the MXU. Precision pinned so f32
    # inputs are not single-pass bf16-truncated (MXU is ~2% utilized, extra
    # passes are free).
    h = jnp.tanh(
        jnp.dot(
            w2_ref[...], h,
            preferred_element_type=jnp.float32,
            precision=jax.lax.Precision.HIGHEST,
        )
        + b2
    )                                                    # (H, TN)

    # Layer 3: weighted sublane reduction over H (XLU) instead of an N=1 matmul.
    o_ref[...] = jnp.sum(w3 * h, axis=0, keepdims=True) + b3_ref[0, 0]


# ------------------------------------------------------------------------ host helpers
def _round_up(x, m):
    return ((x + m - 1) // m) * m


def _num_tensorcores():
    """v7x has 2 TensorCores per chip; v5e/v6e have 1."""
    try:
        kind = jax.devices()[0].device_kind.lower()
    except Exception:
        return 1
    return 2 if "v7" in kind else 1


def choose_tiling(n, *, num_steps=None, max_tile_n=8192):
    """Pick (tile_n, n_pad): one step on single-TC chips, >=2 parallel steps on v7x.

    tile_n is a multiple of 128 (lane width) and capped at max_tile_n so very
    large N can't approach the v7x 32 MiB scoped-VMEM default.
    """
    if num_steps is None:
        num_steps = 2 if (_num_tensorcores() >= 2 and n > 128) else 1
    tile_n = _round_up(pl.cdiv(n, num_steps), 128)
    if tile_n > max_tile_n:
        tile_n = max_tile_n
        num_steps = pl.cdiv(n, tile_n)
    n_pad = tile_n * num_steps
    return tile_n, n_pad


def pack_params(params):
    """Coalesce the (H,1) columns into one (H,4) array: [w1 | b1 | b2 | w3]."""
    packed = jnp.concatenate(
        [params["w1"], params["b1"], params["b2"], params["w3"]], axis=1
    )                                                    # (H, 4)
    return packed, params["w2"], params["b3"]


# ----------------------------------------------------------------------- forward passes
def ode_net_forward_lane_major(x_row, packed, w2, b3, *, tile_n):
    """Hot-loop entry point: x_row is lane-major (1, n_pad) with n_pad % tile_n == 0.

    Returns lane-major (1, n_pad).  Pad/reshape/slice plumbing lives in the caller
    (done once per training run, not per forward call).
    """
    n_pad = x_row.shape[1]
    assert n_pad % tile_n == 0 and tile_n % 128 == 0
    h = packed.shape[0]
    grid = (n_pad // tile_n,)
    rep = lambda shape: pl.BlockSpec(shape, lambda i: (0, 0))   # replicated params

    # VMEM per step: (H, tile_n) f32 activations ~ H*tile_n*4 B (e.g. 20*8192*4 = 640 KiB
    # worst case) -> far under every generation's scoped default; no override needed.
    return pl.pallas_call(
        _ode_net_kernel,
        out_shape=jax.ShapeDtypeStruct((1, n_pad), jnp.float32),
        grid_spec=pltpu.PrefetchScalarGridSpec(
            num_scalar_prefetch=0,
            grid=grid,
            in_specs=[
                pl.BlockSpec((1, tile_n), lambda i: (0, i)),        # x tile
                rep((h, 4)),                                        # packed w1|b1|b2|w3
                rep((h, h)),                                        # w2
                pl.BlockSpec(memory_space=pltpu.MemorySpace.SMEM),  # b3 scalar
            ],
            out_specs=pl.BlockSpec((1, tile_n), lambda i: (0, i)),
        ),
        compiler_params=pltpu.CompilerParams(
            # Lets the >=2 grid steps shard across both TCs on v7x; no-op on
            # single-TC v5e/v6e where the grid is a single step anyway.
            dimension_semantics=("parallel",),
        ),
    )(x_row, packed, w2, b3)


def ode_net_forward(x, params, *, num_steps=None):
    """Convenience wrapper: (N,1) in, (N,1) out.  For a PINN training loop, do the
    pad/reshape once and call ode_net_forward_lane_major directly instead."""
    n = x.shape[0]
    tile_n, n_pad = choose_tiling(n, num_steps=num_steps)
    x_row = x.reshape(1, n)
    if n_pad != n:
        # Padded columns compute bounded garbage (tanh of biases) and are sliced
        # off below; no masking needed.
        x_row = jnp.pad(x_row, ((0, 0), (0, n_pad - n)))
    packed, w2, b3 = pack_params(params)
    out_row = ode_net_forward_lane_major(x_row, packed, w2, b3, tile_n=tile_n)
    return out_row[:, :n].reshape(n, 1)


# ------------------------------------------------------------------------------ init/ref
def init_params(key, hidden_units=20):
    """Deterministic init mimicking nn.Linear (uniform +/- 1/sqrt(fan_in)),
    stored in the kernel's column layout: W as (out,in), biases as (out,1),
    w3 as its transpose (H,1)."""
    ks = jax.random.split(key, 6)

    def lin(kw, kb, fan_in, fan_out):
        bound = 1.0 / jnp.sqrt(jnp.float32(fan_in))
        w = jax.random.uniform(kw, (fan_out, fan_in), jnp.float32, -bound, bound)
        b = jax.random.uniform(kb, (fan_out, 1), jnp.float32, -bound, bound)
        return w, b

    w1, b1 = lin(ks[0], ks[1], 1, hidden_units)               # (H,1), (H,1)
    w2, b2 = lin(ks[2], ks[3], hidden_units, hidden_units)    # (H,H), (H,1)
    w3, b3 = lin(ks[4], ks[5], hidden_units, 1)               # (1,H), (1,1)
    return {"w1": w1, "b1": b1, "w2": w2, "b2": b2, "w3": w3.T, "b3": b3}


def ode_net_reference(x, p):
    """Pure-JAX reference, batch-major, identical math to the PyTorch module."""
    h = jnp.tanh(x @ p["w1"].T + p["b1"].T)          # (N, H)
    h = jnp.tanh(h @ p["w2"].T + p["b2"].T)          # (N, H)
    return h @ p["w3"] + p["b3"]                     # (N, 1)  (w3 stored as W3^T)


# ----------------------------------------------------------------------------------- main
if __name__ == "__main__":
    key = jax.random.PRNGKey(0)
    k_param, k_x = jax.random.split(key)

    hidden_units = 20
    batch = 1000  # collocation points x in (0,1); deliberately not a tile multiple
    params = init_params(k_param, hidden_units)
    x = jax.random.uniform(k_x, (batch, 1), jnp.float32)

    # Generation-aware: grid=(1,) on v5e/v6e (tile_n=1024), grid=(2,) on v7x (tile_n=512).
    out = ode_net_forward(x, params)
    out = jax.block_until_ready(out)

    ref = ode_net_reference(x, params)
    assert out.shape == (batch, 1)
    assert jnp.allclose(out, ref, atol=2e-5, rtol=1e-5), "mismatch vs reference"

    print("KERNEL_OK")
</pallas_src>

<mosaic_0001>
module attributes {stable_mosaic.version = 11 : i64} {
  func.func @_ode_net_kernel(%arg0: i32, %arg1: memref<1x1024xf32, #tpu.memory_space<vmem>>, %arg2: memref<20x4xf32, #tpu.memory_space<vmem>>, %arg3: memref<20x20xf32, #tpu.memory_space<vmem>>, %arg4: memref<1x1xf32, #tpu.memory_space<smem>>, %arg5: memref<1x1024xf32, #tpu.memory_space<vmem>>) attributes {dimension_semantics = [#tpu.dimension_semantics<parallel>], iteration_bounds = array<i64: 1>, scalar_prefetch = 0 : i64, scratch_operands = 0 : i64, tpu.core_type = #tpu.core_type<tc>, window_params = [{transform_indices = @transform_0, window_bounds = array<i64: 1, 1024>}, {pipeline_mode = #tpu.pipeline_mode<synchronous>, transform_indices = @transform_1, window_bounds = array<i64: 20, 4>}, {pipeline_mode = #tpu.pipeline_mode<synchronous>, transform_indices = @transform_2, window_bounds = array<i64: 20, 20>}, {transform_indices = @transform_3, window_bounds = array<i64: 1, 1>}, {transform_indices = @transform_4, window_bounds = array<i64: 1, 1024>}]} {
    %c0 = arith.constant 0 : index
    %c0_0 = arith.constant 0 : index
    %0 = vector.load %arg1[%c0, %c0_0] : memref<1x1024xf32, #tpu.memory_space<vmem>>, vector<1x1024xf32>
    %c0_1 = arith.constant 0 : index
    %c0_2 = arith.constant 0 : index
    %1 = vector.load %arg2[%c0_1, %c0_2] : memref<20x4xf32, #tpu.memory_space<vmem>>, vector<20x4xf32>
    %2 = vector.extract_strided_slice %1 {offsets = [0, 0], sizes = [20, 1], strides = [1, 1]} : vector<20x4xf32> to vector<20x1xf32>
    %3 = vector.extract_strided_slice %1 {offsets = [0, 1], sizes = [20, 1], strides = [1, 1]} : vector<20x4xf32> to vector<20x1xf32>
    %4 = vector.extract_strided_slice %1 {offsets = [0, 2], sizes = [20, 1], strides = [1, 1]} : vector<20x4xf32> to vector<20x1xf32>
    %5 = vector.extract_strided_slice %1 {offsets = [0, 3], sizes = [20, 1], strides = [1, 1]} : vector<20x4xf32> to vector<20x1xf32>
    %6 = vector.broadcast %2 : vector<20x1xf32> to vector<20x1024xf32>
    %7 = vector.broadcast %0 : vector<1x1024xf32> to vector<20x1024xf32>
    %8 = arith.mulf %6, %7 : vector<20x1024xf32>
    %9 = vector.broadcast %3 : vector<20x1xf32> to vector<20x1024xf32>
    %10 = arith.addf %8, %9 : vector<20x1024xf32>
    %11 = math.tanh %10 : vector<20x1024xf32>
    %c0_3 = arith.constant 0 : index
    %c0_4 = arith.constant 0 : index
    %12 = vector.load %arg3[%c0_3, %c0_4] : memref<20x20xf32, #tpu.memory_space<vmem>>, vector<20x20xf32>
    %cst = arith.constant dense<0.000000e+00> : vector<20x1024xf32>
    %13 = tpu.matmul %12, %11, %cst {dimension_numbers = #tpu.dot_dimension_numbers<[1], [0], [0], [1], [0, 0, 1, 1], [], []>, precision = #tpu.contract_precision<fp32>} : vector<20x20xf32>, vector<20x1024xf32>, vector<20x1024xf32> -> vector<20x1024xf32>
    %14 = vector.broadcast %4 : vector<20x1xf32> to vector<20x1024xf32>
    %15 = arith.addf %13, %14 : vector<20x1024xf32>
    %16 = math.tanh %15 : vector<20x1024xf32>
    %17 = vector.broadcast %5 : vector<20x1xf32> to vector<20x1024xf32>
    %18 = arith.mulf %17, %16 : vector<20x1024xf32>
    %cst_5 = arith.constant dense<0.000000e+00> : vector<1024xf32>
    %19 = vector.multi_reduction <add>, %18, %cst_5 [0] : vector<20x1024xf32> to vector<1024xf32>
    %20 = vector.shape_cast %19 : vector<1024xf32> to vector<1x1024xf32>
    %c0_6 = arith.constant 0 : index
    %c0_7 = arith.constant 0 : index
    %21 = memref.load %arg4[%c0_6, %c0_7] : memref<1x1xf32, #tpu.memory_space<smem>>
    %22 = vector.broadcast %21 : f32 to vector<1x1024xf32>
    %23 = arith.addf %20, %22 : vector<1x1024xf32>
    %c0_8 = arith.constant 0 : index
    %c0_9 = arith.constant 0 : index
    %24 = vector.load %arg5[%c0_8, %c0_9] : memref<1x1024xf32, #tpu.memory_space<vmem>>, vector<1x1024xf32>
    tpu.vector_store %arg5[%c0_8, %c0_9], %23 {strides = array<i32>} : memref<1x1024xf32, #tpu.memory_space<vmem>>, vector<1x1024xf32>,
    return
  }
  func.func @transform_0(%arg0: i32) -> (i32, i32) {
    %c0_i32 = arith.constant 0 : i32
    %c0_i32_0 = arith.constant 0 : i32
    return %c0_i32, %arg0 : i32, i32
  }
  func.func @transform_1(%arg0: i32) -> (i32, i32) {
    %c0_i32 = arith.constant 0 : i32
    %c0_i32_0 = arith.constant 0 : i32
    %c0_i32_1 = arith.constant 0 : i32
    return %c0_i32, %c0_i32_0 : i32, i32
  }
  func.func @transform_2(%arg0: i32) -> (i32, i32) {
    %c0_i32 = arith.constant 0 : i32
    %c0_i32_0 = arith.constant 0 : i32
    %c0_i32_1 = arith.constant 0 : i32
    return %c0_i32, %c0_i32_0 : i32, i32
  }
  func.func @transform_3(%arg0: i32) -> (i32, i32) {
    %c0_i32 = arith.constant 0 : i32
    %c0_i32_0 = arith.constant 0 : i32
    %c0_i32_1 = arith.constant 0 : i32
    return %c0_i32, %c0_i32_0 : i32, i32
  }
  func.func @transform_4(%arg0: i32) -> (i32, i32) {
    %c0_i32 = arith.constant 0 : i32
    %c0_i32_0 = arith.constant 0 : i32
    return %c0_i32, %arg0 : i32, i32
  }
}

</mosaic_0001>

<bundles_post_ra>
// kernel: tpu_custom_call.1
= control target key start
LH: loop header
LB: loop body
LE: loop exit
PB: predicated region body
PF: predicated region fallthrough
CT: control target
= control target key end

     0   :  { %10 = vsyncpa [#allocation4], 0  ;;  %s3159_s0 = inlined_call_operand.hbm [shape: f32[1,1024], index: 0, kind: input, shape index: {}]   ;;  %s3160_s1 = inlined_call_operand.vmem [shape: f32[20,4], index: 1, kind: input, shape index: {}]   ;;  %s3161_s2 = inlined_call_operand.vmem [shape: f32[20,20], index: 2, kind: input, shape index: {}]   ;;  %s3162_s3 = inlined_call_operand.<no memory space> [shape: f32[1,1], index: 3, kind: input, shape index: {}]   ;;  %s3163_s4 = inlined_call_operand.hbm [shape: f32[1,1024], index: 4, kind: output, shape index: {}]  }
   0x1   :  { %11 = vsyncpa [#allocation5], 0  ;;  %s17_s17 = sshll.u32 %s3159_s0, 4  ;;  %s2428_s18 = smov [#allocation3]   ;;  %s18_s17 = int_to_ptr.hbm [resolvable:$true] %s17_s17 }
   0x2   :  { %s19_s19 = sshll.u32 %s2428_s18, 4  ;;  %s20_s19 = int_to_ptr.vmem [resolvable:$true] %s19_s19 }
   0x3   :  { %22 = dma.hbm_to_vmem [thread:$0]  %s18_s17, 128, %s20_s19, [#allocation4]  }
   0x4   :  { %2424 = dma.done.wait [#allocation4], 128  }
   0x5   :  { %2425 = vsyncadd [#allocation4], 4294967168  ;;  %v2429_v0 = vmov 0   ;;  %v2430_v1 = vmov 1   ;;  %v2465_v2 = vld [vmem:[%s3160_s1 + $0x10] sm:$0xf] }
   0x6   :  { %2272 = vset.pattern.permute.xlu1 %v2429_v0  ;;  %2270 = vset.pattern.permute.xlu0 %v2429_v0  ;;  %v2470_v3 = vld [vmem:[%s3160_s1 + $0x8] sm:$0xff]  ;;  %v2478_v4 = vld [vmem:[%s3160_s1] sm:$0xff]  ;;  %vm168_vm0 = vcmask 162816   ;;  %v2431_v51 = vmov 2   ;;  %vm178_vm1 = vcmask 1043456   ;;  %vm2232_vm2 = vcmask 1040384  }
   0x7   :  { %2273 = vset.pattern.permute.xlu2 %v2430_v1  ;;  %49 = vperm.xlu0 %2270, %v2465_v2   ;;  %v2483_v5 = vld [vmem:[#allocation3] sm:$0xff]  ;;  %v154_v45 = vld [vmem:[%s3161_s2 + $0x8] sm:$0xff]  ;;  %v155_v55 = vld [vmem:[%s3161_s2 + $0x10] sm:$0xf]  ;;  %vm2234_vm3 = vcmask 1042434   ;;  %vm2236_vm4 = vcmask 1041408  }
   0x8   :  { %44 = vperm.xlu1 %2272, %v2470_v3   ;;  %98 = vperm.xlu2 %2273, %v2470_v3   ;;  %v2486_v6 = vperm.slane %v2483_v5, 5  ;;  %v2489_v7 = vperm.slane %v2483_v5, 7  ;;  %v53_v8 = vperm.slane %v2483_v5, 0  ;;  %v54_v9 = vperm.slane %v2483_v5, 1  ;;  %v153_v20 = vld [vmem:[%s3161_s2] sm:$0xff]  ;;  %s2254_s8 = sshll.u32 %s3163_s4, 4  ;;  %s2255_s8 = int_to_ptr.hbm [resolvable:$true] %s2254_s8 }
   0x9   :  { %v2494_v10 = vperm.slane %v2483_v5, 4  ;;  %v2511_v16 = vperm.slane %v2483_v5, 6  ;;  %v170_v28 = vsel %vm168_vm0, %v153_v20, 0  ;;  %v173_v48 = vsel %vm168_vm0, %v154_v45, 0 }
   0xa   :  { %v2554_v36 = vand.u32 4294901760, %v170_v28  ;;  %v2580_v53 = vand.u32 4294901760, %v173_v48  ;;  %vm2238_vm5 = vcmask 1044484   ;;  %vm2240_vm6 = vcmask 1046534  }
   0xb   :  { %vm2242_vm7 = vcmask 1045508  }
   0xc   :  { %v2564_v43 = vsub.f32 %v170_v28, %v2554_v36 }
   0xe   :  { %v2574_v50 = vand.u32 4294901760, %v2564_v43 }
   0xf   :  { %2271 = vset.pattern.permute.xlu0 %v2430_v1 }
  0x10   :  { %39 = vperm.xlu1 %2272, %v2478_v4   ;;  %102 = vperm.xlu0 %2271, %v2465_v2   ;;  %v225_v59 = vsub.f32 %v2564_v43, %v2574_v50 }
  0x11   :  { %94 = vperm.xlu2 %2273, %v2478_v4  }
  0x18   :  { %2274 = vset.pattern.permute.xlu1 %v2431_v51  ;;  %2276 = vset.pattern.permute.xlu0 %v2431_v51 }
  0x19   :  { %157 = vperm.xlu1 %2274, %v2478_v4   ;;  %165 = vperm.xlu0 %2276, %v2465_v2  }
  0x1a   :  { %2275 = vset.pattern.permute.xlu2 %v2431_v51 }
  0x1b   :  { %161 = vperm.xlu2 %2275, %v2470_v3  }
  0x62   :  { %v2500_v13 = vpop.permute.xlu2 %98 }
  0x6b   :  { %v2557_v38 = vpop.permute.xlu2 %94 }
  0x79   :  { %v2496_v11 = vpop.permute.xlu0 %49 }
  0x7a   :  { %v2498_v12 = vpop.permute.xlu1 %44  ;;  %v2504_v14 = vmul.f32 %v2486_v6, %v2496_v11  ;;  %v2508_v15 = vmul.f32 %v2489_v7, %v2496_v11  ;;  %v2517_v19 = vmul.f32 %v2494_v10, %v2496_v11  ;;  %v2529_v24 = vmul.f32 %v2511_v16, %v2496_v11 }
  0x7b   :  { %v77_v17 = vmul.f32 %v53_v8, %v2498_v12  ;;  %v78_v18 = vmul.f32 %v54_v9, %v2498_v12  ;;  %v81_v21 = vmul.f32 %v2494_v10, %v2498_v12  ;;  %v82_v23 = vmul.f32 %v2486_v6, %v2498_v12 }
  0x7c   :  { %v83_v27 = vmul.f32 %v2511_v16, %v2498_v12  ;;  %v2543_v30 = vmul.f32 %v2489_v7, %v2498_v12  ;;  %v85_v34 = vmul.f32 %v53_v8, %v2496_v11  ;;  %v86_v40 = vmul.f32 %v54_v9, %v2496_v11 }
  0x7d   :  { %v113_v22 = vadd.f32 %v2500_v13, %v77_v17  ;;  %v114_v25 = vadd.f32 %v2500_v13, %v78_v18  ;;  %v2533_v26 = vadd.f32 %v2500_v13, %v81_v21  ;;  %v2539_v29 = vadd.f32 %v2500_v13, %v82_v23 }
  0x7e   :  { %v2548_v32 = vadd.f32 %v2500_v13, %v83_v27 }
  0x7f   :  { %2280 = vtanh.f32 %v113_v22  ;;  %v2610_v22 = vand.u32 4294901760, %v225_v59 }
  0x80   :  { %2282 = vtanh.f32 %v114_v25  ;;  %v55_v25 = vperm.slane %v2483_v5, 2 }
  0x82   :  { %v2545_v31 = vpop.permute.xlu1 %39  ;;  %v2550_v33 = vpop.permute.xlu0 %102  ;;  %v87_v51 = vmul.f32 %v55_v25, %v2496_v11 }
  0x83   :  { %v69_v35 = vmul.f32 %v53_v8, %v2545_v31  ;;  %v70_v37 = vmul.f32 %v54_v9, %v2545_v31  ;;  %v121_v39 = vadd.f32 %v2550_v33, %v85_v34  ;;  %v122_v42 = vadd.f32 %v2550_v33, %v86_v40 }
  0x84   :  { %v2599_v8 = vsub.f32 %v173_v48, %v2580_v53  ;;  %v176_v9 = vsel %vm168_vm0, %v155_v55, 0  ;;  %v123_v59 = vadd.f32 %v2550_v33, %v87_v51 }
  0x85   :  { %v105_v41 = vadd.f32 %v2557_v38, %v69_v35  ;;  %v106_v44 = vadd.f32 %v2557_v38, %v70_v37  ;;  %v2281_v46 = vpop.eup %2280  ;;  %2284 = vtanh.f32 %v121_v39  ;;  %v2623_v40 = vand.u32 4294901760, %v176_v9 }
  0x86   :  { %v2283_v47 = vpop.eup %2282  ;;  %v2571_v49 = vand.u32 4294901760, %v2281_v46  ;;  %v2621_v39 = vand.u32 4294901760, %v2599_v8 }
  0x87   :  { %2286 = vtanh.f32 %v105_v41  ;;  %v2576_v52 = vand.u32 4294901760, %v2283_v47 }
  0x88   :  { %2288 = vtanh.f32 %v122_v42  ;;  %v267_v58 = vsub.f32 %v2281_v46, %v2571_v49  ;;  %v233_v55 = vsub.f32 %v2599_v8, %v2621_v39 }
  0x89   :  { %2290 = vtanh.f32 %v106_v44  ;;  %v2595_v63 = vsub.f32 %v2283_v47, %v2576_v52 }
  0x8a   :  { %v268_v23 = vand.u32 4294901760, %v267_v58  ;;  %2292 = vtanh.f32 %v123_v59 }
  0x8b   :  { %v2285_v54 = vpop.eup %2284  ;;  %v502_v34 = vand.u32 4294901760, %v2595_v63 }
  0x8c   :  { %v180_v57 = vsel %vm178_vm1, %v2285_v54, 0  ;;  %v269_v45 = vsub.f32 %v267_v58, %v268_v23 }
  0x8d   :  { %v2287_v56 = vpop.eup %2286  ;;  %v2590_v61 = vand.u32 4294901760, %v180_v57  ;;  %v503_v48 = vsub.f32 %v2595_v63, %v502_v34 }
  0x8e   :  { %v2289_v60 = vpop.eup %2288  ;;  %v2592_v62 = vand.u32 4294901760, %v2287_v56 }
  0x8f   :  { %v2291_v0 = vpop.eup %2290  ;;  %v183_v1 = vsel %vm178_vm1, %v2289_v60, 0  ;;  %217 = vmatpush.msra.mxu0 %v2590_v61  ;;  %343 = vmatpush.msra.mxu3 %v2590_v61  ;;  %v261_v17 = vsub.f32 %v180_v57, %v2590_v61  ;;  %v270_v60 = vand.u32 4294901760, %v269_v45  ;;  %v56_v45 = vperm.slane %v2483_v5, 3 }
  0x90   :  { %v273_v18 = vsub.f32 %v2287_v56, %v2592_v62  ;;  %v2606_v20 = vand.u32 4294901760, %v183_v1  ;;  %v2608_v21 = vand.u32 4294901760, %v2291_v0  ;;  %v2637_v56 = vsub.f32 %v176_v9, %v2623_v40 }
  0x91   :  { %219 = vmatpush.msra.mxu0 %v2571_v49  ;;  %306 = vmatpush.msra.mxu2 %v261_v17  ;;  %v262_v27 = vand.u32 4294901760, %v261_v17  ;;  %v88_v5 = vmul.f32 %v56_v45, %v2496_v11  ;;  %v80_v11 = vmul.f32 %v56_v45, %v2498_v12 }
  0x92   :  { %v495_v28 = vsub.f32 %v183_v1, %v2606_v20  ;;  %v2617_v35 = vsub.f32 %v2291_v0, %v2608_v21  ;;  %345 = vmatpush.msra.mxu3 %v2571_v49  ;;  %v274_v37 = vand.u32 4294901760, %v273_v18  ;;  %v79_v0 = vmul.f32 %v55_v25, %v2498_v12 }
  0x93   :  { %221 = vmatpush.msra.mxu0 %v2592_v62  ;;  %309 = vmatpush.msra.mxu2 %v267_v58  ;;  %v263_v41 = vsub.f32 %v261_v17, %v262_v27  ;;  %v504_v1 = vand.u32 4294901760, %v503_v48  ;;  %v2645_v17 = vand.u32 4294901760, %v233_v55  ;;  %v2432_v12 = vmov 3  }
  0x94   :  { %v496_v42 = vand.u32 4294901760, %v495_v28  ;;  %v508_v44 = vand.u32 4294901760, %v2617_v35  ;;  %347 = vmatpush.msra.mxu3 %v2592_v62  ;;  %227 = vmatmul.f32.vlgmr.msra.gmra.mxu0 %v2610_v22  ;;  %v275_v54 = vsub.f32 %v273_v18, %v274_v37 }
  0x95   :  { %351 = vmatmul.f32.vlgmr.msra.gmra.mxu3 %v2574_v50  ;;  %383 = vmatpush.msrb.mxu0 %v262_v27  ;;  %v264_v46 = vand.u32 4294901760, %v263_v41 }
  0x96   :  { %v497_v47 = vsub.f32 %v495_v28, %v496_v42  ;;  %312 = vmatpush.msra.mxu2 %v273_v18  ;;  %v509_v58 = vsub.f32 %v2617_v35, %v508_v44  ;;  %v276_v9 = vand.u32 4294901760, %v275_v54  ;;  %v2648_v18 = vand.u32 4294901760, %v2637_v56  ;;  %2277 = vset.pattern.permute.xlu1 %v2432_v12 }
  0x97   :  { %315 = vmatmul.f32.vlgmr.msra.gmra.mxu2 %v2564_v43  ;;  %387 = vmatpush.msrb.mxu0 %v268_v23  ;;  %v71_v23 = vmul.f32 %v55_v25, %v2545_v31 }
  0x98   :  { %v498_v57 = vand.u32 4294901760, %v497_v47  ;;  %451 = vmatpush.msrb.mxu2 %v2606_v20  ;;  %265 = vmatpush.msra.mxu1 %v264_v46  ;;  %v510_v27 = vand.u32 4294901760, %v509_v58  ;;  %v241_v41 = vsub.f32 %v2637_v56, %v2648_v18  ;;  %v116_v46 = vadd.f32 %v2500_v13, %v80_v11 }
  0x99   :  { %391 = vmatpush.msrb.mxu0 %v274_v37  ;;  %v115_v37 = vadd.f32 %v2500_v13, %v79_v0  ;;  %v107_v25 = vadd.f32 %v2557_v38, %v71_v23  ;;  %2278 = vset.pattern.permute.xlu2 %v2432_v12 }
  0x9a   :  { %499 = vmatpush.msrb.mxu3 %v498_v57  ;;  %453 = vmatpush.msrb.mxu2 %v2576_v52 }
  0x9b   :  { %271 = vmatpush.msra.mxu1 %v270_v60  ;;  %540 = vmatpush.msra.mxu0 %v495_v28  ;;  %v2660_v28 = vadd.f32 %v2500_v13, %v2543_v30  ;;  %2294 = vtanh.f32 %v115_v37  ;;  %v2672_v30 = vand.u32 4294901760, %v241_v41 }
  0x9c   :  { %505 = vmatpush.msrb.mxu3 %v504_v1  ;;  %455 = vmatpush.msrb.mxu2 %v2608_v21  ;;  %2296 = vtanh.f32 %v107_v25 }
  0x9d   :  { %277 = vmatpush.msra.mxu1 %v276_v9  ;;  %543 = vmatpush.msra.mxu0 %v2595_v63 }
  0x9e   :  { %511 = vmatpush.msrb.mxu3 %v510_v27  ;;  %617 = vmatpush.msra.mxu2 %v496_v42  ;;  %v2293_v42 = vpop.eup %2292 }
  0x9f   :  { %235 = vmatmul.f32.gmra.mxu0 %v2645_v17  ;;  %279 = vmatmul.f32.vlgmr.msra.gmra.mxu1 %v2554_v36 }
  0xa0   :  { %357 = vmatmul.f32.gmra.mxu3 %v2621_v39  ;;  %419 = vmatpush.msrb.mxu1 %v2590_v61  ;;  %v186_v61 = vsel %vm178_vm1, %v2293_v42, 0 }
  0xa1   :  { %653 = vmatpush.msra.mxu3 %v2606_v20  ;;  %546 = vmatpush.msra.mxu0 %v2617_v35  ;;  %v2295_v63 = vpop.eup %2294 }
  0xa2   :  { %621 = vmatpush.msra.mxu2 %v502_v34  ;;  %421 = vmatpush.msrb.mxu1 %v2571_v49  ;;  %v124_v34 = vadd.f32 %v2550_v33, %v88_v5  ;;  %v2684_v49 = vand.u32 4294901760, %v186_v61  ;;  %v2689_v35 = vand.u32 4294901760, %v2295_v63 }
  0xa3   :  { %320 = vmatmul.f32.gmra.mxu2 %v2599_v8  ;;  %655 = vmatpush.msra.mxu3 %v2576_v52 }
  0xa4   :  { %625 = vmatpush.msra.mxu2 %v508_v44  ;;  %423 = vmatpush.msrb.mxu1 %v2592_v62  ;;  %v2297_v62 = vpop.eup %2296  ;;  %2298 = vtanh.f32 %v124_v34  ;;  %v2700_v47 = vsub.f32 %v2295_v63, %v2689_v35 }
  0xa5   :  { %657 = vmatpush.msra.mxu3 %v2608_v21  ;;  %v2696_v44 = vand.u32 4294901760, %v2297_v62  ;;  %2100 = vperm.xlu1 %2277, %v2478_v4   ;;  %2300 = vtanh.f32 %v116_v46  ;;  %v126_v46 = vadd.f32 %v2550_v33, %v2504_v14 }
  0xa6   :  { %577 = vmatpush.msra.mxu1 %v2606_v20  ;;  %v72_v20 = vmul.f32 %v56_v45, %v2545_v31  ;;  %2104 = vperm.xlu2 %2278, %v2470_v3   ;;  %v736_v3 = vand.u32 4294901760, %v2700_v47 }
  0xa7   :  { %243 = vmatmul.f32.gmra.mxu0 %v2672_v30  ;;  %283 = vmatmul.f32.gmra.mxu1 %v2580_v53  ;;  %v741_v13 = vsub.f32 %v2297_v62, %v2696_v44 }
  0xa8   :  { %579 = vmatpush.msra.mxu1 %v2576_v52  ;;  %363 = vmatmul.f32.gmra.mxu3 %v2648_v18  ;;  %v2694_v52 = vsub.f32 %v186_v61, %v2684_v49  ;;  %v737_v58 = vsub.f32 %v2700_v47, %v736_v3 }
  0xa9   :  { %2279 = vset.pattern.permute.xlu0 %v2432_v12  ;;  %v742_v54 = vand.u32 4294901760, %v741_v13 }
  0xaa   :  { %581 = vmatpush.msra.mxu1 %v2608_v21  ;;  %v108_v21 = vadd.f32 %v2557_v38, %v72_v20  ;;  %v730_v48 = vand.u32 4294901760, %v2694_v52  ;;  %v2299_v51 = vpop.eup %2298  ;;  %v738_v23 = vand.u32 4294901760, %v737_v58 }
  0xab   :  { %325 = vmatmul.f32.gmra.mxu2 %v2637_v56  ;;  %v189_v55 = vsel %vm178_vm1, %v2299_v51, 0  ;;  %v2301_v57 = vpop.eup %2300  ;;  %v743_v1 = vsub.f32 %v741_v13, %v742_v54 }
  0xac   :  { %2302 = vtanh.f32 %v108_v21  ;;  %v731_v4 = vsub.f32 %v2694_v52, %v730_v48  ;;  %v2725_v59 = vand.u32 4294901760, %v189_v55  ;;  %v2729_v9 = vand.u32 4294901760, %v2301_v57 }
  0xad   :  { %2108 = vperm.xlu1 %2277, %v2465_v2   ;;  %v744_v37 = vand.u32 4294901760, %v743_v1  ;;  %v74_v21 = vmul.f32 %v2486_v6, %v2545_v31 }
  0xae   :  { %v732_v0 = vand.u32 4294901760, %v731_v4  ;;  %v963_v2 = vsub.f32 %v189_v55, %v2725_v59  ;;  %v969_v41 = vsub.f32 %v2301_v57, %v2729_v9 }
  0xaf   :  { %393 = vmatmul.f32.vlgmr.msrb.gmra.mxu0 %v2554_v36  ;;  %287 = vmatmul.f32.gmra.mxu1 %v2623_v40  ;;  %v110_v51 = vadd.f32 %v2557_v38, %v74_v21 }
  0xb0   :  { %513 = vmatmul.f32.vlgmr.msrb.gmra.mxu3 %v2554_v36  ;;  %685 = vmatpush.msrb.mxu0 %v2684_v49  ;;  %v964_v25 = vand.u32 4294901760, %v963_v2  ;;  %v970_v42 = vand.u32 4294901760, %v969_v41 }
  0xb1   :  { %811 = vmatpush.msrb.mxu3 %v2684_v49 }
  0xb2   :  { %687 = vmatpush.msrb.mxu0 %v2689_v35  ;;  %v2303_v60 = vpop.eup %2302  ;;  %v965_v5 = vsub.f32 %v963_v2, %v964_v25  ;;  %v971_v63 = vsub.f32 %v969_v41, %v970_v42 }
  0xb3   :  { %461 = vmatmul.f32.vlgmr.msrb.gmra.mxu2 %v2610_v22  ;;  %813 = vmatpush.msrb.mxu3 %v2689_v35  ;;  %v2733_v27 = vand.u32 4294901760, %v2303_v60 }
  0xb4   :  { %774 = vmatpush.msrb.mxu2 %v2694_v52  ;;  %689 = vmatpush.msrb.mxu0 %v2696_v44  ;;  %v966_v34 = vand.u32 4294901760, %v965_v5  ;;  %v972_v62 = vand.u32 4294901760, %v971_v63 }
  0xb5   :  { %815 = vmatpush.msrb.mxu3 %v2696_v44  ;;  %v975_v45 = vsub.f32 %v2303_v60, %v2733_v27 }
  0xb6   :  { %777 = vmatpush.msrb.mxu2 %v2700_v47 }
  0xb7   :  { %397 = vmatmul.f32.gmra.mxu0 %v2580_v53  ;;  %425 = vmatmul.f32.vlgmr.msrb.gmra.mxu1 %v2554_v36  ;;  %v976_v61 = vand.u32 4294901760, %v975_v45 }
  0xb8   :  { %780 = vmatpush.msrb.mxu2 %v741_v13  ;;  %517 = vmatmul.f32.gmra.mxu3 %v2580_v53 }
  0xb9   :  { %733 = vmatpush.msrb.mxu1 %v732_v0  ;;  %v977_v11 = vsub.f32 %v975_v45, %v976_v61 }
  0xbb   :  { %469 = vmatmul.f32.gmra.mxu2 %v2645_v17  ;;  %739 = vmatpush.msrb.mxu1 %v738_v23  ;;  %v978_v20 = vand.u32 4294901760, %v977_v11 }
  0xbd   :  { %745 = vmatpush.msrb.mxu1 %v744_v37 }
  0xbf   :  { %401 = vmatmul.f32.gmra.mxu0 %v2623_v40  ;;  %429 = vmatmul.f32.gmra.mxu1 %v2580_v53 }
  0xc0   :  { %521 = vmatmul.f32.gmra.mxu3 %v2623_v40 }
  0xc3   :  { %477 = vmatmul.f32.gmra.mxu2 %v2672_v30 }
  0xc7   :  { %549 = vmatmul.f32.vlgmr.msra.gmra.mxu0 %v2564_v43  ;;  %433 = vmatmul.f32.gmra.mxu1 %v2623_v40 }
  0xc8   :  { %659 = vmatmul.f32.vlgmr.msra.gmra.mxu3 %v2554_v36  ;;  %851 = vmatpush.msra.mxu0 %v730_v48 }
  0xc9   :  { %967 = vmatpush.msra.mxu3 %v966_v34 }
  0xca   :  { %855 = vmatpush.msra.mxu0 %v736_v3 }
  0xcb   :  { %627 = vmatmul.f32.vlgmr.msra.gmra.mxu2 %v2554_v36  ;;  %973 = vmatpush.msra.mxu3 %v972_v62 }
  0xcc   :  { %919 = vmatpush.msra.mxu2 %v2725_v59  ;;  %859 = vmatpush.msra.mxu0 %v742_v54 }
  0xcd   :  { %979 = vmatpush.msra.mxu3 %v978_v20 }
  0xce   :  { %921 = vmatpush.msra.mxu2 %v2729_v9 }
  0xcf   :  { %554 = vmatmul.f32.gmra.mxu0 %v2599_v8  ;;  %585 = vmatmul.f32.vlgmr.msra.gmra.mxu1 %v2574_v50 }
  0xd0   :  { %923 = vmatpush.msra.mxu2 %v2733_v27  ;;  %663 = vmatmul.f32.gmra.mxu3 %v2580_v53 }
  0xd1   :  { %887 = vmatpush.msra.mxu1 %v2684_v49  ;;  %v125_v49 = vadd.f32 %v2550_v33, %v2517_v19 }
  0xd3   :  { %631 = vmatmul.f32.gmra.mxu2 %v2580_v53  ;;  %889 = vmatpush.msra.mxu1 %v2689_v35  ;;  %v73_v35 = vmul.f32 %v2494_v10, %v2545_v31  ;;  %2304 = vtanh.f32 %v125_v49 }
  0xd4   :  { %2306 = vtanh.f32 %v2533_v26 }
  0xd5   :  { %891 = vmatpush.msra.mxu1 %v2696_v44  ;;  %v109_v19 = vadd.f32 %v2557_v38, %v73_v35 }
  0xd7   :  { %559 = vmatmul.f32.gmra.mxu0 %v2637_v56  ;;  %591 = vmatmul.f32.gmra.mxu1 %v2621_v39  ;;  %2308 = vtanh.f32 %v109_v19  ;;  %v2852_v19 = vpop.permute.xlu1 %157 }
  0xd8   :  { %667 = vmatmul.f32.gmra.mxu3 %v2623_v40  ;;  %2310 = vtanh.f32 %v126_v46 }
  0xd9   :  { %v2305_v52 = vpop.eup %2304  ;;  %2312 = vtanh.f32 %v2539_v29 }
  0xda   :  { %v192_v10 = vsel %vm178_vm1, %v2305_v52, 0  ;;  %v2307_v44 = vpop.eup %2306  ;;  %2314 = vtanh.f32 %v110_v51 }
  0xdb   :  { %635 = vmatmul.f32.gmra.mxu2 %v2623_v40  ;;  %v2784_v26 = vand.u32 4294901760, %v192_v10  ;;  %v2787_v47 = vand.u32 4294901760, %v2307_v44 }
  0xdd   :  { %v2309_v12 = vpop.eup %2308  ;;  %v1197_v13 = vsub.f32 %v192_v10, %v2784_v26  ;;  %v1203_v48 = vsub.f32 %v2307_v44, %v2787_v47 }
  0xde   :  { %v2793_v14 = vand.u32 4294901760, %v2309_v12  ;;  %v2311_v4 = vpop.eup %2310 }
  0xdf   :  { %695 = vmatmul.f32.vlgmr.msrb.gmra.mxu0 %v2610_v22  ;;  %597 = vmatmul.f32.gmra.mxu1 %v2648_v18  ;;  %v1198_v6 = vand.u32 4294901760, %v1197_v13  ;;  %v1204_v54 = vand.u32 4294901760, %v1203_v48  ;;  %v195_v29 = vsel %vm178_vm1, %v2311_v4, 0  ;;  %v2313_v58 = vpop.eup %2312 }
  0xe0   :  { %819 = vmatmul.f32.vlgmr.msrb.gmra.mxu3 %v2574_v50  ;;  %1008 = vmatpush.msrb.mxu0 %v963_v2  ;;  %v1209_v3 = vsub.f32 %v2309_v12, %v2793_v14  ;;  %v2811_v60 = vand.u32 4294901760, %v195_v29  ;;  %v2315_v0 = vpop.eup %2314  ;;  %v2815_v23 = vand.u32 4294901760, %v2313_v58 }
  0xe1   :  { %1121 = vmatpush.msrb.mxu3 %v2725_v59  ;;  %v1199_v55 = vsub.f32 %v1197_v13, %v1198_v6  ;;  %v2821_v37 = vand.u32 4294901760, %v2315_v0 }
  0xe2   :  { %1011 = vmatpush.msrb.mxu0 %v969_v41  ;;  %v1210_v57 = vand.u32 4294901760, %v1209_v3 }
  0xe3   :  { %783 = vmatmul.f32.vlgmr.msrb.gmra.mxu2 %v2564_v43  ;;  %1123 = vmatpush.msrb.mxu3 %v2729_v9  ;;  %v1200_v1 = vand.u32 4294901760, %v1199_v55  ;;  %v127_v55 = vadd.f32 %v2550_v33, %v2529_v24 }
  0xe4   :  { %1085 = vmatpush.msrb.mxu2 %v964_v25  ;;  %1014 = vmatpush.msrb.mxu0 %v975_v45  ;;  %v2824_v25 = vsub.f32 %v2313_v58, %v2815_v23 }
  0xe5   :  { %1125 = vmatpush.msrb.mxu3 %v2733_v27  ;;  %2316 = vtanh.f32 %v127_v55 }
  0xe6   :  { %1089 = vmatpush.msrb.mxu2 %v970_v42  ;;  %v2829_v42 = vsub.f32 %v2315_v0, %v2821_v37  ;;  %v1438_v5 = vand.u32 4294901760, %v2824_v25  ;;  %v75_v0 = vmul.f32 %v2511_v16, %v2545_v31  ;;  %2318 = vtanh.f32 %v2548_v32 }
  0xe7   :  { %703 = vmatmul.f32.gmra.mxu0 %v2645_v17  ;;  %747 = vmatmul.f32.vlgmr.msrb.gmra.mxu1 %v2554_v36  ;;  %v128_v32 = vadd.f32 %v2550_v33, %v2508_v15 }
  0xe8   :  { %1093 = vmatpush.msrb.mxu2 %v976_v61  ;;  %825 = vmatmul.f32.gmra.mxu3 %v2621_v39  ;;  %v1444_v63 = vand.u32 4294901760, %v2829_v42  ;;  %v1439_v34 = vsub.f32 %v2824_v25, %v1438_v5 }
  0xe9   :  { %1045 = vmatpush.msrb.mxu1 %v2725_v59  ;;  %v1205_v59 = vsub.f32 %v1203_v48, %v1204_v54 }
  0xea   :  { %v1445_v62 = vsub.f32 %v2829_v42, %v1444_v63  ;;  %v1440_v20 = vand.u32 4294901760, %v1439_v34 }
  0xeb   :  { %788 = vmatmul.f32.gmra.mxu2 %v2599_v8  ;;  %1047 = vmatpush.msrb.mxu1 %v2729_v9  ;;  %v1211_v9 = vsub.f32 %v1209_v3, %v1210_v57  ;;  %v1206_v2 = vand.u32 4294901760, %v1205_v59 }
  0xec   :  { %v1446_v35 = vand.u32 4294901760, %v1445_v62 }
  0xed   :  { %1049 = vmatpush.msrb.mxu1 %v2733_v27  ;;  %v2819_v27 = vsub.f32 %v195_v29, %v2811_v60  ;;  %v1212_v41 = vand.u32 4294901760, %v1211_v9 }
  0xef   :  { %711 = vmatmul.f32.gmra.mxu0 %v2672_v30  ;;  %751 = vmatmul.f32.gmra.mxu1 %v2580_v53  ;;  %v1432_v45 = vand.u32 4294901760, %v2819_v27 }
  0xf0   :  { %831 = vmatmul.f32.gmra.mxu3 %v2648_v18 }
  0xf1   :  { %v1433_v61 = vsub.f32 %v2819_v27, %v1432_v45 }
  0xf3   :  { %793 = vmatmul.f32.gmra.mxu2 %v2637_v56  ;;  %v1434_v11 = vand.u32 4294901760, %v1433_v61 }
  0xf7   :  { %861 = vmatmul.f32.vlgmr.msra.gmra.mxu0 %v2554_v36  ;;  %755 = vmatmul.f32.gmra.mxu1 %v2623_v40 }
  0xf8   :  { %981 = vmatmul.f32.vlgmr.msra.gmra.mxu3 %v2554_v36  ;;  %1153 = vmatpush.msra.mxu0 %v2784_v26 }
  0xf9   :  { %1279 = vmatpush.msra.mxu3 %v2784_v26 }
  0xfa   :  { %1155 = vmatpush.msra.mxu0 %v2787_v47 }
  0xfb   :  { %929 = vmatmul.f32.vlgmr.msra.gmra.mxu2 %v2610_v22  ;;  %1281 = vmatpush.msra.mxu3 %v2787_v47 }
  0xfc   :  { %1242 = vmatpush.msra.mxu2 %v1197_v13  ;;  %1157 = vmatpush.msra.mxu0 %v2793_v14 }
  0xfd   :  { %1283 = vmatpush.msra.mxu3 %v2793_v14 }
  0xfe   :  { %1245 = vmatpush.msra.mxu2 %v1203_v48  ;;  %v2864_v48 = vpop.permute.xlu2 %161 }
  0xff   :  { %865 = vmatmul.f32.gmra.mxu0 %v2580_v53  ;;  %893 = vmatmul.f32.vlgmr.msra.gmra.mxu1 %v2554_v36 }
 0x100   :  { %1248 = vmatpush.msra.mxu2 %v1209_v3  ;;  %985 = vmatmul.f32.gmra.mxu3 %v2580_v53 }
 0x101   :  { %1201 = vmatpush.msra.mxu1 %v1200_v1 }
 0x103   :  { %937 = vmatmul.f32.gmra.mxu2 %v2645_v17  ;;  %1207 = vmatpush.msra.mxu1 %v1206_v2 }
 0x105   :  { %1213 = vmatpush.msra.mxu1 %v1212_v41  ;;  %v111_v41 = vadd.f32 %v2557_v38, %v75_v0 }
 0x107   :  { %869 = vmatmul.f32.gmra.mxu0 %v2623_v40  ;;  %897 = vmatmul.f32.gmra.mxu1 %v2580_v53  ;;  %2320 = vtanh.f32 %v111_v41 }
 0x108   :  { %989 = vmatmul.f32.gmra.mxu3 %v2623_v40  ;;  %2322 = vtanh.f32 %v128_v32 }
 0x10b   :  { %945 = vmatmul.f32.gmra.mxu2 %v2672_v30 }
 0x10f   :  { %1017 = vmatmul.f32.vlgmr.msrb.gmra.mxu0 %v2564_v43  ;;  %901 = vmatmul.f32.gmra.mxu1 %v2623_v40 }
 0x110   :  { %1127 = vmatmul.f32.vlgmr.msrb.gmra.mxu3 %v2554_v36  ;;  %1319 = vmatpush.msrb.mxu0 %v1198_v6 }
 0x111   :  { %1435 = vmatpush.msrb.mxu3 %v1434_v11  ;;  %v228_v49 = vpop.f32.mrf.mxu0 }
 0x112   :  { %1323 = vmatpush.msrb.mxu0 %v1204_v54  ;;  %v229_v10 = vadd.f32 %v228_v49, %v2852_v19  ;;  %v2872_v54 = vpop.permute.xlu0 %165  ;;  %v76_v49 = vmul.f32 %v2489_v7, %v2545_v31 }
 0x113   :  { %1095 = vmatmul.f32.vlgmr.msrb.gmra.mxu2 %v2554_v36  ;;  %1441 = vmatpush.msrb.mxu3 %v1440_v20 }
 0x114   :  { %1387 = vmatpush.msrb.mxu2 %v2811_v60  ;;  %1327 = vmatpush.msrb.mxu0 %v1210_v57 }
 0x115   :  { %1447 = vmatpush.msrb.mxu3 %v1446_v35 }
 0x116   :  { %1389 = vmatpush.msrb.mxu2 %v2815_v23 }
 0x117   :  { %1022 = vmatmul.f32.gmra.mxu0 %v2599_v8  ;;  %1053 = vmatmul.f32.vlgmr.msrb.gmra.mxu1 %v2574_v50 }
 0x118   :  { %1391 = vmatpush.msrb.mxu2 %v2821_v37  ;;  %1131 = vmatmul.f32.gmra.mxu3 %v2580_v53  ;;  %v352_v52 = vpop.f32.mrf.mxu3 }
 0x119   :  { %1355 = vmatpush.msrb.mxu1 %v2784_v26 }
 0x11a   :  { %v316_v46 = vpop.f32.mrf.mxu2 }
 0x11b   :  { %1099 = vmatmul.f32.gmra.mxu2 %v2580_v53  ;;  %1357 = vmatpush.msrb.mxu1 %v2787_v47 }
 0x11c   :  { %v236_v44 = vpop.f32.mrf.mxu0  ;;  %v280_v12 = vpop.f32.mrf.mxu1 }
 0x11d   :  { %1359 = vmatpush.msrb.mxu1 %v2793_v14  ;;  %v281_v21 = vadd.f32 %v280_v12, %v229_v10  ;;  %v237_v47 = vadd.f32 %v236_v44, %v2864_v48 }
 0x11f   :  { %1027 = vmatmul.f32.gmra.mxu0 %v2637_v56  ;;  %v317_v13 = vadd.f32 %v316_v46, %v281_v21  ;;  %1059 = vmatmul.f32.gmra.mxu1 %v2621_v39 }
 0x120   :  { %1135 = vmatmul.f32.gmra.mxu3 %v2623_v40 }
 0x121   :  { %v353_v26 = vadd.f32 %v352_v52, %v317_v13  ;;  %v112_v13 = vadd.f32 %v2557_v38, %v76_v49 }
 0x123   :  { %1103 = vmatmul.f32.gmra.mxu2 %v2623_v40  ;;  %v358_v51 = vpop.f32.mrf.mxu3 }
 0x124   :  { %v244_v3 = vpop.f32.mrf.mxu0  ;;  %v284_v6 = vpop.f32.mrf.mxu1 }
 0x125   :  { %v285_v14 = vadd.f32 %v284_v6, %v237_v47  ;;  %v245_v58 = vadd.f32 %v244_v3, %v2872_v54 }
 0x126   :  { %v321_v4 = vpop.f32.mrf.mxu2 }
 0x127   :  { %1163 = vmatmul.f32.vlgmr.msra.gmra.mxu0 %v2610_v22  ;;  %v322_v57 = vadd.f32 %v321_v4, %v285_v14  ;;  %1065 = vmatmul.f32.gmra.mxu1 %v2648_v18 }
 0x128   :  { %1287 = vmatmul.f32.vlgmr.msra.gmra.mxu3 %v2574_v50  ;;  %1476 = vmatpush.msra.mxu0 %v2819_v27  ;;  %v2317_v27 = vpop.eup %2316 }
 0x129   :  { %1589 = vmatpush.msra.mxu3 %v2811_v60  ;;  %v359_v29 = vadd.f32 %v358_v51, %v322_v57  ;;  %v2319_v34 = vpop.eup %2318 }
 0x12a   :  { %1479 = vmatpush.msra.mxu0 %v2824_v25 }
 0x12b   :  { %1251 = vmatmul.f32.vlgmr.msra.gmra.mxu2 %v2564_v43  ;;  %1591 = vmatpush.msra.mxu3 %v2815_v23  ;;  %v364_v59 = vpop.f32.mrf.mxu3 }
 0x12c   :  { %1553 = vmatpush.msra.mxu2 %v1432_v45  ;;  %1482 = vmatpush.msra.mxu0 %v2829_v42  ;;  %v394_v24 = vpop.f32.mrf.mxu0  ;;  %v288_v1 = vpop.f32.mrf.mxu1  ;;  %v198_v42 = vsel %vm178_vm1, %v2317_v27, 0 }
 0x12d   :  { %1593 = vmatpush.msra.mxu3 %v2821_v37  ;;  %v289_v2 = vadd.f32 %v288_v1, %v245_v58  ;;  %v2907_v11 = vand.u32 4294901760, %v198_v42  ;;  %v395_v62 = vadd.f32 %v394_v24, %v353_v26  ;;  %v2950_v58 = vpop.permute.xlu1 %2100 }
 0x12e   :  { %1557 = vmatpush.msra.mxu2 %v1438_v5  ;;  %v326_v9 = vpop.f32.mrf.mxu2 }
 0x12f   :  { %1171 = vmatmul.f32.gmra.mxu0 %v2645_v17  ;;  %v327_v16 = vadd.f32 %v326_v9, %v289_v2  ;;  %1215 = vmatmul.f32.vlgmr.msra.gmra.mxu1 %v2554_v36  ;;  %v2918_v52 = vsub.f32 %v198_v42, %v2907_v11 }
 0x130   :  { %1561 = vmatpush.msra.mxu2 %v1444_v63  ;;  %1293 = vmatmul.f32.gmra.mxu3 %v2621_v39 }
 0x131   :  { %1513 = vmatpush.msra.mxu1 %v2811_v60  ;;  %v365_v25 = vadd.f32 %v364_v59, %v327_v16  ;;  %v1666_v47 = vand.u32 4294901760, %v2918_v52  ;;  %v2953_v59 = vpop.permute.xlu2 %2104 }
 0x133   :  { %1256 = vmatmul.f32.gmra.mxu2 %v2599_v8  ;;  %v514_v45 = vpop.f32.mrf.mxu3  ;;  %1515 = vmatpush.msra.mxu1 %v2815_v23  ;;  %v2321_v23 = vpop.eup %2320  ;;  %v1667_v4 = vsub.f32 %v2918_v52, %v1666_v47 }
 0x134   :  { %v398_v5 = vpop.f32.mrf.mxu0  ;;  %v426_v61 = vpop.f32.mrf.mxu1  ;;  %v2920_v10 = vand.u32 4294901760, %v2321_v23 }
 0x135   :  { %1517 = vmatpush.msra.mxu1 %v2821_v37  ;;  %v2912_v37 = vand.u32 4294901760, %v2319_v34  ;;  %v427_v15 = vadd.f32 %v426_v61, %v395_v62  ;;  %v399_v44 = vadd.f32 %v398_v5, %v359_v29  ;;  %v2323_v51 = vpop.eup %2322  ;;  %v1668_v42 = vand.u32 4294901760, %v1667_v4 }
 0x136   :  { %v462_v63 = vpop.f32.mrf.mxu2  ;;  %v2931_v26 = vsub.f32 %v2321_v23, %v2920_v10  ;;  %v201_v55 = vsel %vm178_vm1, %v2323_v51, 0 }
 0x137   :  { %v463_v60 = vadd.f32 %v462_v63, %v2852_v19  ;;  %1179 = vmatmul.f32.gmra.mxu0 %v2672_v30  ;;  %1219 = vmatmul.f32.gmra.mxu1 %v2580_v53  ;;  %v2923_v21 = vsub.f32 %v2319_v34, %v2912_v37  ;;  %2324 = vtanh.f32 %v427_v15  ;;  %v2961_v27 = vand.u32 4294901760, %v201_v55 }
 0x138   :  { %1299 = vmatmul.f32.gmra.mxu3 %v2648_v18  ;;  %2326 = vtanh.f32 %v2660_v28  ;;  %v1678_v14 = vand.u32 4294901760, %v2931_v26 }
 0x139   :  { %v2910_v20 = vadd.f32 %v514_v45, %v463_v60  ;;  %v1672_v3 = vand.u32 4294901760, %v2923_v21  ;;  %v2975_v62 = vsub.f32 %v201_v55, %v2961_v27 }
 0x13a   :  { %v1679_v61 = vsub.f32 %v2931_v26, %v1678_v14 }
 0x13b   :  { %1261 = vmatmul.f32.gmra.mxu2 %v2637_v56  ;;  %v518_v33 = vpop.f32.mrf.mxu3  ;;  %v1673_v9 = vsub.f32 %v2923_v21, %v1672_v3  ;;  %v1900_v51 = vand.u32 4294901760, %v2975_v62 }
 0x13c   :  { %v402_v35 = vpop.f32.mrf.mxu0  ;;  %v430_v46 = vpop.f32.mrf.mxu1  ;;  %v1680_v15 = vand.u32 4294901760, %v1679_v61 }
 0x13d   :  { %v431_v7 = vadd.f32 %v430_v46, %v399_v44  ;;  %v2325_v57 = vpop.eup %2324  ;;  %v403_v29 = vadd.f32 %v402_v35, %v365_v25  ;;  %v1674_v60 = vand.u32 4294901760, %v1673_v9  ;;  %v2980_v44 = vpop.permute.xlu1 %2108 }
 0x13e   :  { %v470_v12 = vpop.f32.mrf.mxu2  ;;  %v2327_v0 = vpop.eup %2326  ;;  %v2111_v45 = vmul.f32 %v2325_v57, %v2950_v58 }
 0x13f   :  { %v471_v31 = vadd.f32 %v470_v12, %v2864_v48  ;;  %1329 = vmatmul.f32.vlgmr.msrb.gmra.mxu0 %v2554_v36  ;;  %2328 = vtanh.f32 %v431_v7  ;;  %1223 = vmatmul.f32.gmra.mxu1 %v2623_v40  ;;  %v2971_v34 = vand.u32 4294901760, %v2327_v0 }
 0x140   :  { %1449 = vmatmul.f32.vlgmr.msrb.gmra.mxu3 %v2554_v36  ;;  %1621 = vmatpush.msrb.mxu0 %v2907_v11  ;;  %2330 = vtanh.f32 %v112_v13 }
 0x141   :  { %1747 = vmatpush.msrb.mxu3 %v2907_v11  ;;  %v2937_v38 = vadd.f32 %v518_v33, %v471_v31  ;;  %v2983_v46 = vsub.f32 %v2327_v0, %v2971_v34  ;;  %v1901_v0 = vsub.f32 %v2975_v62, %v1900_v51 }
 0x142   :  { %1623 = vmatpush.msrb.mxu0 %v2912_v37 }
 0x143   :  { %1397 = vmatmul.f32.vlgmr.msrb.gmra.mxu2 %v2610_v22  ;;  %1749 = vmatpush.msrb.mxu3 %v2912_v37  ;;  %v522_v6 = vpop.f32.mrf.mxu3 }
 0x144   :  { %1710 = vmatpush.msrb.mxu2 %v2918_v52  ;;  %1625 = vmatpush.msrb.mxu0 %v2920_v10  ;;  %v550_v28 = vpop.f32.mrf.mxu0  ;;  %v434_v24 = vpop.f32.mrf.mxu1 }
 0x145   :  { %1751 = vmatpush.msrb.mxu3 %v2920_v10  ;;  %v2329_v2 = vpop.eup %2328  ;;  %v435_v41 = vadd.f32 %v434_v24, %v403_v29  ;;  %v551_v35 = vadd.f32 %v550_v28, %v2910_v20  ;;  %v1906_v28 = vand.u32 4294901760, %v2983_v46 }
 0x146   :  { %1713 = vmatpush.msrb.mxu2 %v2923_v21  ;;  %v478_v1 = vpop.f32.mrf.mxu2  ;;  %v2331_v25 = vpop.eup %2330  ;;  %v2119_v5 = vmul.f32 %v2329_v2, %v2953_v59 }
 0x147   :  { %v479_v16 = vadd.f32 %v478_v1, %v2872_v54  ;;  %1333 = vmatmul.f32.gmra.mxu0 %v2580_v53  ;;  %2332 = vtanh.f32 %v435_v41  ;;  %1361 = vmatmul.f32.vlgmr.msrb.gmra.mxu1 %v2554_v36  ;;  %v2977_v49 = vand.u32 4294901760, %v2331_v25  ;;  %v1907_v41 = vsub.f32 %v2983_v46, %v1906_v28 }
 0x148   :  { %1716 = vmatpush.msrb.mxu2 %v2931_v26  ;;  %1453 = vmatmul.f32.gmra.mxu3 %v2580_v53  ;;  %v2135_v32 = vadd.f32 %v2119_v5, %v2111_v45  ;;  %v1902_v5 = vand.u32 4294901760, %v1901_v0 }
 0x149   :  { %v523_v63 = vadd.f32 %v522_v6, %v479_v16  ;;  %1669 = vmatpush.msrb.mxu1 %v1668_v42  ;;  %v2988_v6 = vsub.f32 %v2331_v25, %v2977_v49  ;;  %v1908_v61 = vand.u32 4294901760, %v1907_v41 }
 0x14b   :  { %1405 = vmatmul.f32.gmra.mxu2 %v2645_v17  ;;  %v660_v23 = vpop.f32.mrf.mxu3  ;;  %1675 = vmatpush.msrb.mxu1 %v1674_v60  ;;  %v1912_v1 = vand.u32 4294901760, %v2988_v6 }
 0x14c   :  { %v555_v33 = vpop.f32.mrf.mxu0  ;;  %v586_v12 = vpop.f32.mrf.mxu1 }
 0x14d   :  { %1681 = vmatpush.msrb.mxu1 %v1680_v15  ;;  %v2333_v7 = vpop.eup %2332  ;;  %v587_v31 = vadd.f32 %v586_v12, %v551_v35  ;;  %v556_v2 = vadd.f32 %v555_v33, %v2937_v38  ;;  %v1913_v42 = vsub.f32 %v2988_v6, %v1912_v1 }
 0x14e   :  { %v628_v13 = vpop.f32.mrf.mxu2  ;;  %v2127_v4 = vmul.f32 %v2333_v7, %v2980_v44 }
 0x14f   :  { %1337 = vmatmul.f32.gmra.mxu0 %v2623_v40  ;;  %v629_v20 = vadd.f32 %v628_v13, %v587_v31  ;;  %1365 = vmatmul.f32.gmra.mxu1 %v2580_v53  ;;  %v1914_v60 = vand.u32 4294901760, %v1913_v42 }
 0x150   :  { %1457 = vmatmul.f32.gmra.mxu3 %v2623_v40  ;;  %v2136_v55 = vsel %vm178_vm1, %v2127_v4, 0.0 }
 0x151   :  { %v2995_v57 = vadd.f32 %v2136_v55, %v2135_v32  ;;  %v661_v29 = vadd.f32 %v660_v23, %v629_v20 }
 0x153   :  { %1413 = vmatmul.f32.gmra.mxu2 %v2672_v30  ;;  %v664_v24 = vpop.f32.mrf.mxu3  ;;  %2334 = vtanh.f32 %v661_v29  ;;  %v2138_v4 = vrot.slane %v2995_v57, 4 }
 0x154   :  { %v560_v9 = vpop.f32.mrf.mxu0  ;;  %v592_v16 = vpop.f32.mrf.mxu1 }
 0x155   :  { %v593_v45 = vadd.f32 %v592_v16, %v556_v2 }
 0x156   :  { %v632_v25 = vpop.f32.mrf.mxu2 }
 0x157   :  { %1485 = vmatmul.f32.vlgmr.msra.gmra.mxu0 %v2564_v43  ;;  %v633_v38 = vadd.f32 %v632_v25, %v593_v45  ;;  %1369 = vmatmul.f32.gmra.mxu1 %v2623_v40 }
 0x158   :  { %1595 = vmatmul.f32.vlgmr.msra.gmra.mxu3 %v2554_v36  ;;  %1787 = vmatpush.msra.mxu0 %v1666_v47  ;;  %v561_v47 = vadd.f32 %v560_v9, %v523_v63 }
 0x159   :  { %1903 = vmatpush.msra.mxu3 %v1902_v5  ;;  %v665_v32 = vadd.f32 %v664_v24, %v633_v38  ;;  %v2335_v33 = vpop.eup %2334  ;;  %v2139_v24 = vadd.f32 %v2138_v4, %v2995_v57 }
 0x15a   :  { %1791 = vmatpush.msra.mxu0 %v1672_v3  ;;  %v2112_v13 = vmul.f32 %v2335_v33, %v2950_v58 }
 0x15b   :  { %1563 = vmatmul.f32.vlgmr.msra.gmra.mxu2 %v2554_v36  ;;  %1909 = vmatpush.msra.mxu3 %v1908_v61  ;;  %v668_v23 = vpop.f32.mrf.mxu3  ;;  %2336 = vtanh.f32 %v665_v32  ;;  %v2140_v42 = vrot.slane %v2139_v24, 2 }
 0x15c   :  { %1855 = vmatpush.msra.mxu2 %v2961_v27  ;;  %1795 = vmatpush.msra.mxu0 %v1678_v14  ;;  %v696_v52 = vpop.f32.mrf.mxu0  ;;  %v598_v21 = vpop.f32.mrf.mxu1 }
 0x15d   :  { %1915 = vmatpush.msra.mxu3 %v1914_v60  ;;  %v599_v15 = vadd.f32 %v598_v21, %v561_v47  ;;  %v697_v14 = vadd.f32 %v696_v52, %v2852_v19  ;;  %v2141_v60 = vadd.f32 %v2140_v42, %v2139_v24 }
 0x15e   :  { %1857 = vmatpush.msra.mxu2 %v2971_v34  ;;  %v636_v3 = vpop.f32.mrf.mxu2 }
 0x15f   :  { %1490 = vmatmul.f32.gmra.mxu0 %v2599_v8  ;;  %v637_v35 = vadd.f32 %v636_v3, %v599_v15  ;;  %1521 = vmatmul.f32.vlgmr.msra.gmra.mxu1 %v2574_v50 }
 0x160   :  { %1859 = vmatpush.msra.mxu2 %v2977_v49  ;;  %1599 = vmatmul.f32.gmra.mxu3 %v2580_v53 }
 0x161   :  { %1823 = vmatpush.msra.mxu1 %v2907_v11  ;;  %v2337_v26 = vpop.eup %2336  ;;  %v669_v63 = vadd.f32 %v668_v23, %v637_v35 }
 0x162   :  { %v2120_v7 = vmul.f32 %v2337_v26, %v2953_v59 }
 0x163   :  { %1567 = vmatmul.f32.gmra.mxu2 %v2580_v53  ;;  %v820_v12 = vpop.f32.mrf.mxu3  ;;  %1825 = vmatpush.msra.mxu1 %v2912_v37  ;;  %2338 = vtanh.f32 %v669_v63 }
 0x164   :  { %v704_v31 = vpop.f32.mrf.mxu0  ;;  %v2144_v20 = vadd.f32 %v2120_v7, %v2112_v13  ;;  %v748_v11 = vpop.f32.mrf.mxu1 }
 0x165   :  { %1827 = vmatpush.msra.mxu1 %v2920_v10  ;;  %v749_v29 = vadd.f32 %v748_v11, %v697_v14  ;;  %v705_v9 = vadd.f32 %v704_v31, %v2864_v48  ;;  %v2142_v14 = vrot.slane %v2141_v60, 1  ;;  %v3066_v31 = vstv %s3162_s3  ;;  %s2433_s3 = smov [#allocation6]  }
 0x166   :  { %v784_v55 = vpop.f32.mrf.mxu2  ;;  %s2252_s5 = sshll.u32 %s2433_s3, 4  ;;  %s2253_s5 = int_to_ptr.vmem [resolvable:$true] %s2252_s5 }
 0x167   :  { %1495 = vmatmul.f32.gmra.mxu0 %v2637_v56  ;;  %v785_v0 = vadd.f32 %v784_v55, %v749_v29  ;;  %1527 = vmatmul.f32.gmra.mxu1 %v2621_v39 }
 0x168   :  { %1603 = vmatmul.f32.gmra.mxu3 %v2623_v40 }
 0x169   :  { %v2339_v37 = vpop.eup %2338  ;;  %v821_v2 = vadd.f32 %v820_v12, %v785_v0 }
 0x16a   :  { %v2128_v10 = vmul.f32 %v2339_v37, %v2980_v44 }
 0x16b   :  { %1571 = vmatmul.f32.gmra.mxu2 %v2623_v40  ;;  %v826_v41 = vpop.f32.mrf.mxu3 }
 0x16c   :  { %v712_v16 = vpop.f32.mrf.mxu0  ;;  %v2145_v25 = vsel %vm178_vm1, %v2128_v10, 0.0  ;;  %v752_v45 = vpop.f32.mrf.mxu1 }
 0x16d   :  { %v2146_v38 = vadd.f32 %v2145_v25, %v2144_v20  ;;  %v753_v61 = vadd.f32 %v752_v45, %v705_v9  ;;  %v713_v52 = vadd.f32 %v712_v16, %v2872_v54 }
 0x16e   :  { %v789_v5 = vpop.f32.mrf.mxu2 }
 0x16f   :  { %1631 = vmatmul.f32.vlgmr.msrb.gmra.mxu0 %v2610_v22  ;;  %v2147_v57 = vrot.slane %v2146_v38, 4  ;;  %v790_v32 = vadd.f32 %v789_v5, %v753_v61  ;;  %1533 = vmatmul.f32.gmra.mxu1 %v2648_v18 }
 0x170   :  { %1755 = vmatmul.f32.vlgmr.msrb.gmra.mxu3 %v2574_v50  ;;  %1944 = vmatpush.msrb.mxu0 %v2975_v62 }
 0x171   :  { %2057 = vmatpush.msrb.mxu3 %v2961_v27  ;;  %v2148_v23 = vadd.f32 %v2147_v57, %v2146_v38  ;;  %v827_v47 = vadd.f32 %v826_v41, %v790_v32 }
 0x172   :  { %1947 = vmatpush.msrb.mxu0 %v2983_v46  ;;  %v2143_v46 = vadd.f32 %v2142_v14, %v2141_v60 }
 0x173   :  { %1719 = vmatmul.f32.vlgmr.msrb.gmra.mxu2 %v2564_v43  ;;  %2059 = vmatpush.msrb.mxu3 %v2971_v34  ;;  %v832_v21 = vpop.f32.mrf.mxu3  ;;  %v2149_v15 = vrot.slane %v2148_v23, 2 }
 0x174   :  { %2021 = vmatpush.msrb.mxu2 %v1900_v51  ;;  %1950 = vmatpush.msrb.mxu0 %v2988_v6  ;;  %v862_v3 = vpop.f32.mrf.mxu0  ;;  %v756_v35 = vpop.f32.mrf.mxu1  ;;  %v2209_v11 = vadd.f32 %v3066_v31, %v2143_v46 }
 0x175   :  { %2061 = vmatpush.msrb.mxu3 %v2977_v49  ;;  %v863_v33 = vadd.f32 %v862_v3, %v821_v2  ;;  %v2150_v63 = vadd.f32 %v2149_v15, %v2148_v23  ;;  %v757_v12 = vadd.f32 %v756_v35, %v713_v52 }
 0x176   :  { %2025 = vmatpush.msrb.mxu2 %v1906_v28  ;;  %v794_v26 = vpop.f32.mrf.mxu2 }
 0x177   :  { %1639 = vmatmul.f32.gmra.mxu0 %v2645_v17  ;;  %v795_v62 = vadd.f32 %v794_v26, %v757_v12  ;;  %1683 = vmatmul.f32.vlgmr.msrb.gmra.mxu1 %v2554_v36  ;;  %v2151_v51 = vrot.slane %v2150_v63, 1 }
 0x178   :  { %2029 = vmatpush.msrb.mxu2 %v1912_v1  ;;  %1761 = vmatmul.f32.gmra.mxu3 %v2621_v39 }
 0x179   :  { %1981 = vmatpush.msrb.mxu1 %v2961_v27  ;;  %v833_v28 = vadd.f32 %v832_v21, %v795_v62  ;;  %v2152_v7 = vadd.f32 %v2151_v51, %v2150_v63 }
 0x17b   :  { %1724 = vmatmul.f32.gmra.mxu2 %v2599_v8  ;;  %v982_v13 = vpop.f32.mrf.mxu3  ;;  %1983 = vmatpush.msrb.mxu1 %v2971_v34  ;;  %v2210_v4 = vadd.f32 %v3066_v31, %v2152_v7 }
 0x17c   :  { %v866_v6 = vpop.f32.mrf.mxu0  ;;  %v894_v27 = vpop.f32.mrf.mxu1 }
 0x17d   :  { %v867_v1 = vadd.f32 %v866_v6, %v827_v47  ;;  %1985 = vmatpush.msrb.mxu1 %v2977_v49  ;;  %v895_v55 = vadd.f32 %v894_v27, %v863_v33  ;;  %v2225_v0 = vrot.slane %v2210_v4, 7 }
 0x17e   :  { %v930_v20 = vpop.f32.mrf.mxu2 }
 0x17f   :  { %v931_v29 = vadd.f32 %v930_v20, %v2852_v19  ;;  %1647 = vmatmul.f32.gmra.mxu0 %v2672_v30  ;;  %1687 = vmatmul.f32.gmra.mxu1 %v2580_v53  ;;  %v3076_v24 = vsel %vm2232_vm2, %v2209_v11, %v2225_v0  ;;  %2340 = vtanh.f32 %v895_v55 }
 0x180   :  { %1767 = vmatmul.f32.gmra.mxu3 %v2648_v18 }
 0x181   :  { %v983_v34 = vadd.f32 %v982_v13, %v931_v29 }
 0x183   :  { %1729 = vmatmul.f32.gmra.mxu2 %v2637_v56  ;;  %v986_v49 = vpop.f32.mrf.mxu3 }
 0x184   :  { %v870_v37 = vpop.f32.mrf.mxu0  ;;  %v898_v2 = vpop.f32.mrf.mxu1 }
 0x185   :  { %v871_v9 = vadd.f32 %v870_v37, %v833_v28  ;;  %v899_v10 = vadd.f32 %v898_v2, %v867_v1  ;;  %v2341_v42 = vpop.eup %2340 }
 0x186   :  { %v938_v41 = vpop.f32.mrf.mxu2  ;;  %v2113_v52 = vmul.f32 %v2341_v42, %v2950_v58 }
 0x187   :  { %v939_v16 = vadd.f32 %v938_v41, %v2864_v48  ;;  %1797 = vmatmul.f32.vlgmr.msra.gmra.mxu0 %v2554_v36  ;;  %2342 = vtanh.f32 %v899_v10  ;;  %1691 = vmatmul.f32.gmra.mxu1 %v2623_v40 }
 0x188   :  { %1917 = vmatmul.f32.vlgmr.msra.gmra.mxu3 %v2554_v36 }
 0x189   :  { %v987_v25 = vadd.f32 %v986_v49, %v939_v16 }
 0x18b   :  { %1865 = vmatmul.f32.vlgmr.msra.gmra.mxu2 %v2610_v22  ;;  %v990_v45 = vpop.f32.mrf.mxu3 }
 0x18c   :  { %v1018_v5 = vpop.f32.mrf.mxu0  ;;  %v902_v61 = vpop.f32.mrf.mxu1 }
 0x18d   :  { %v1019_v38 = vadd.f32 %v1018_v5, %v983_v34  ;;  %v2343_v32 = vpop.eup %2342  ;;  %v903_v60 = vadd.f32 %v902_v61, %v871_v9 }
 0x18e   :  { %v946_v57 = vpop.f32.mrf.mxu2  ;;  %v2121_v47 = vmul.f32 %v2343_v32, %v2953_v59 }
 0x18f   :  { %v947_v23 = vadd.f32 %v946_v57, %v2872_v54  ;;  %1801 = vmatmul.f32.gmra.mxu0 %v2580_v53  ;;  %2344 = vtanh.f32 %v903_v60  ;;  %1829 = vmatmul.f32.vlgmr.msra.gmra.mxu1 %v2554_v36 }
 0x190   :  { %1921 = vmatmul.f32.gmra.mxu3 %v2580_v53  ;;  %v2153_v21 = vadd.f32 %v2121_v47, %v2113_v52 }
 0x191   :  { %v991_v22 = vadd.f32 %v990_v45, %v947_v23 }
 0x193   :  { %1873 = vmatmul.f32.gmra.mxu2 %v2645_v17  ;;  %v1128_v3 = vpop.f32.mrf.mxu3 }
 0x194   :  { %v1023_v15 = vpop.f32.mrf.mxu0  ;;  %v1054_v35 = vpop.f32.mrf.mxu1 }
 0x195   :  { %v1024_v33 = vadd.f32 %v1023_v15, %v987_v25  ;;  %v2345_v14 = vpop.eup %2344  ;;  %v1055_v63 = vadd.f32 %v1054_v35, %v1019_v38 }
 0x196   :  { %v1096_v26 = vpop.f32.mrf.mxu2  ;;  %v2129_v12 = vmul.f32 %v2345_v14, %v2980_v44 }
 0x197   :  { %1805 = vmatmul.f32.gmra.mxu0 %v2623_v40  ;;  %v1097_v62 = vadd.f32 %v1096_v26, %v1055_v63  ;;  %1833 = vmatmul.f32.gmra.mxu1 %v2580_v53 }
 0x198   :  { %1925 = vmatmul.f32.gmra.mxu3 %v2623_v40  ;;  %v2154_v51 = vsel %vm178_vm1, %v2129_v12, 0.0 }
 0x199   :  { %v2155_v46 = vadd.f32 %v2154_v51, %v2153_v21  ;;  %v1129_v17 = vadd.f32 %v1128_v3, %v1097_v62 }
 0x19b   :  { %1881 = vmatmul.f32.gmra.mxu2 %v2672_v30  ;;  %v1132_v28 = vpop.f32.mrf.mxu3  ;;  %2346 = vtanh.f32 %v1129_v17  ;;  %v2156_v49 = vrot.slane %v2155_v46, 4 }
 0x19c   :  { %v1028_v13 = vpop.f32.mrf.mxu0  ;;  %v1060_v6 = vpop.f32.mrf.mxu1 }
 0x19d   :  { %v1029_v7 = vadd.f32 %v1028_v13, %v991_v22  ;;  %v1061_v4 = vadd.f32 %v1060_v6, %v1024_v33 }
 0x19e   :  { %v1100_v1 = vpop.f32.mrf.mxu2 }
 0x19f   :  { %1953 = vmatmul.f32.vlgmr.msrb.gmra.mxu0 %v2564_v43  ;;  %v1101_v27 = vadd.f32 %v1100_v1, %v1061_v4  ;;  %1837 = vmatmul.f32.gmra.mxu1 %v2623_v40 }
 0x1a0   :  { %2063 = vmatmul.f32.vlgmr.msrb.gmra.mxu3 %v2554_v36 }
 0x1a1   :  { %v1133_v20 = vadd.f32 %v1132_v28, %v1101_v27  ;;  %v2347_v43 = vpop.eup %2346 }
 0x1a2   :  { %v2114_v41 = vmul.f32 %v2347_v43, %v2950_v58 }
 0x1a3   :  { %2031 = vmatmul.f32.vlgmr.msrb.gmra.mxu2 %v2554_v36  ;;  %v1136_v11 = vpop.f32.mrf.mxu3  ;;  %2348 = vtanh.f32 %v1133_v20 }
 0x1a4   :  { %v1164_v55 = vpop.f32.mrf.mxu0  ;;  %v1066_v30 = vpop.f32.mrf.mxu1 }
 0x1a5   :  { %v1067_v0 = vadd.f32 %v1066_v30, %v1029_v7  ;;  %v1165_v9 = vadd.f32 %v1164_v55, %v2852_v19 }
 0x1a6   :  { %v1104_v29 = vpop.f32.mrf.mxu2 }
 0x1a7   :  { %1958 = vmatmul.f32.gmra.mxu0 %v2599_v8  ;;  %v1105_v34 = vadd.f32 %v1104_v29, %v1067_v0  ;;  %1989 = vmatmul.f32.vlgmr.msrb.gmra.mxu1 %v2574_v50  ;;  %v2157_v8 = vadd.f32 %v2156_v49, %v2155_v46 }
 0x1a8   :  { %2067 = vmatmul.f32.gmra.mxu3 %v2580_v53 }
 0x1a9   :  { %v2349_v37 = vpop.eup %2348  ;;  %v1137_v2 = vadd.f32 %v1136_v11, %v1105_v34 }
 0x1aa   :  { %v2122_v10 = vmul.f32 %v2349_v37, %v2953_v59 }
 0x1ab   :  { %2035 = vmatmul.f32.gmra.mxu2 %v2580_v53  ;;  %v1288_v36 = vpop.f32.mrf.mxu3  ;;  %2350 = vtanh.f32 %v1137_v2  ;;  %v2158_v53 = vrot.slane %v2157_v8, 2 }
 0x1ac   :  { %v1172_v16 = vpop.f32.mrf.mxu0  ;;  %v2162_v25 = vadd.f32 %v2122_v10, %v2114_v41  ;;  %v1216_v45 = vpop.f32.mrf.mxu1 }
 0x1ad   :  { %v1217_v42 = vadd.f32 %v1216_v45, %v1165_v9  ;;  %v1173_v61 = vadd.f32 %v1172_v16, %v2864_v48  ;;  %v2159_v52 = vadd.f32 %v2158_v53, %v2157_v8 }
 0x1ae   :  { %v1252_v5 = vpop.f32.mrf.mxu2 }
 0x1af   :  { %1963 = vmatmul.f32.gmra.mxu0 %v2637_v56  ;;  %v1253_v50 = vadd.f32 %v1252_v5, %v1217_v42  ;;  %1995 = vmatmul.f32.gmra.mxu1 %v2621_v39  ;;  %v2160_v33 = vrot.slane %v2159_v52, 1 }
 0x1b0   :  { %2071 = vmatmul.f32.gmra.mxu3 %v2623_v40 }
 0x1b1   :  { %v2351_v38 = vpop.eup %2350  ;;  %v1289_v57 = vadd.f32 %v1288_v36, %v1253_v50  ;;  %v2161_v17 = vadd.f32 %v2160_v33, %v2159_v52 }
 0x1b2   :  { %v2130_v60 = vmul.f32 %v2351_v38, %v2980_v44 }
 0x1b3   :  { %2039 = vmatmul.f32.gmra.mxu2 %v2623_v40  ;;  %v1294_v32 = vpop.f32.mrf.mxu3  ;;  %v2211_v1 = vadd.f32 %v3066_v31, %v2161_v17 }
 0x1b4   :  { %v1180_v23 = vpop.f32.mrf.mxu0  ;;  %v2163_v47 = vsel %vm178_vm1, %v2130_v60, 0.0  ;;  %v1220_v56 = vpop.f32.mrf.mxu1 }
 0x1b5   :  { %v2164_v21 = vadd.f32 %v2163_v47, %v2162_v25  ;;  %v1221_v3 = vadd.f32 %v1220_v56, %v1173_v61  ;;  %v1181_v26 = vadd.f32 %v1180_v23, %v2872_v54  ;;  %v2226_v0 = vrot.slane %v2211_v1, 6 }
 0x1b6   :  { %v1257_v22 = vpop.f32.mrf.mxu2 }
 0x1b7   :  { %v2165_v15 = vrot.slane %v2164_v21, 4  ;;  %v1258_v39 = vadd.f32 %v1257_v22, %v1221_v3  ;;  %2001 = vmatmul.f32.gmra.mxu1 %v2648_v18 }
 0x1b9   :  { %v2166_v35 = vadd.f32 %v2165_v15, %v2164_v21  ;;  %v1295_v40 = vadd.f32 %v1294_v32, %v1258_v39 }
 0x1bb   :  { %v1300_v14 = vpop.f32.mrf.mxu3  ;;  %v2167_v12 = vrot.slane %v2166_v35, 2 }
 0x1bc   :  { %v1330_v63 = vpop.f32.mrf.mxu0  ;;  %v1224_v51 = vpop.f32.mrf.mxu1 }
 0x1bd   :  { %v1331_v62 = vadd.f32 %v1330_v63, %v1289_v57  ;;  %v2168_v28 = vadd.f32 %v2167_v12, %v2166_v35  ;;  %v1225_v13 = vadd.f32 %v1224_v51, %v1181_v26 }
 0x1be   :  { %v1262_v46 = vpop.f32.mrf.mxu2 }
 0x1bf   :  { %v2169_v7 = vrot.slane %v2168_v28, 1  ;;  %v1263_v6 = vadd.f32 %v1262_v46, %v1225_v13 }
 0x1c1   :  { %v1301_v4 = vadd.f32 %v1300_v14, %v1263_v6  ;;  %v2170_v27 = vadd.f32 %v2169_v7, %v2168_v28 }
 0x1c3   :  { %v1450_v18 = vpop.f32.mrf.mxu3  ;;  %v2212_v55 = vadd.f32 %v3066_v31, %v2170_v27 }
 0x1c4   :  { %v1334_v20 = vpop.f32.mrf.mxu0  ;;  %v1362_v30 = vpop.f32.mrf.mxu1 }
 0x1c5   :  { %v1335_v11 = vadd.f32 %v1334_v20, %v1295_v40  ;;  %v1363_v43 = vadd.f32 %v1362_v30, %v1331_v62  ;;  %v2227_v49 = vrot.slane %v2212_v55, 5 }
 0x1c6   :  { %v1398_v29 = vpop.f32.mrf.mxu2 }
 0x1c7   :  { %v1399_v34 = vadd.f32 %v1398_v29, %v2852_v19  ;;  %v2235_v9 = vsel %vm2234_vm3, %v2226_v0, %v2227_v49  ;;  %2352 = vtanh.f32 %v1363_v43 }
 0x1c8   :  { %v3121_v2 = vsel %vm2236_vm4, %v3076_v24, %v2235_v9 }
 0x1c9   :  { %v1451_v37 = vadd.f32 %v1450_v18, %v1399_v34 }
 0x1cb   :  { %v1454_v36 = vpop.f32.mrf.mxu3 }
 0x1cc   :  { %v1338_v41 = vpop.f32.mrf.mxu0  ;;  %v1366_v16 = vpop.f32.mrf.mxu1 }
 0x1cd   :  { %v1339_v10 = vadd.f32 %v1338_v41, %v1301_v4  ;;  %v1367_v25 = vadd.f32 %v1366_v16, %v1335_v11  ;;  %v2353_v53 = vpop.eup %2352 }
 0x1ce   :  { %v1406_v8 = vpop.f32.mrf.mxu2  ;;  %v2115_v23 = vmul.f32 %v2353_v53, %v2950_v58 }
 0x1cf   :  { %v1407_v45 = vadd.f32 %v1406_v8, %v2864_v48  ;;  %2354 = vtanh.f32 %v1367_v25 }
 0x1d1   :  { %v1455_v5 = vadd.f32 %v1454_v36, %v1407_v45 }
 0x1d3   :  { %v1458_v42 = vpop.f32.mrf.mxu3 }
 0x1d4   :  { %v1486_v50 = vpop.f32.mrf.mxu0  ;;  %v1370_v61 = vpop.f32.mrf.mxu1 }
 0x1d5   :  { %v1487_v38 = vadd.f32 %v1486_v50, %v1451_v37  ;;  %v2355_v32 = vpop.eup %2354  ;;  %v1371_v24 = vadd.f32 %v1370_v61, %v1339_v10 }
 0x1d6   :  { %v1414_v57 = vpop.f32.mrf.mxu2  ;;  %v2123_v52 = vmul.f32 %v2355_v32, %v2953_v59 }
 0x1d7   :  { %v1415_v60 = vadd.f32 %v1414_v57, %v2872_v54  ;;  %2356 = vtanh.f32 %v1371_v24 }
 0x1d8   :  { %v2171_v56 = vadd.f32 %v2123_v52, %v2115_v23 }
 0x1d9   :  { %v1459_v47 = vadd.f32 %v1458_v42, %v1415_v60 }
 0x1db   :  { %v1596_v22 = vpop.f32.mrf.mxu3 }
 0x1dc   :  { %v1491_v21 = vpop.f32.mrf.mxu0  ;;  %v1522_v15 = vpop.f32.mrf.mxu1 }
 0x1dd   :  { %v1492_v3 = vadd.f32 %v1491_v21, %v1455_v5  ;;  %v2357_v33 = vpop.eup %2356  ;;  %v1523_v35 = vadd.f32 %v1522_v15, %v1487_v38 }
 0x1de   :  { %v1564_v39 = vpop.f32.mrf.mxu2  ;;  %v2131_v26 = vmul.f32 %v2357_v33, %v2980_v44 }
 0x1df   :  { %v1565_v40 = vadd.f32 %v1564_v39, %v1523_v35 }
 0x1e0   :  { %v2172_v14 = vsel %vm178_vm1, %v2131_v26, 0.0 }
 0x1e1   :  { %v2173_v63 = vadd.f32 %v2172_v14, %v2171_v56  ;;  %v1597_v12 = vadd.f32 %v1596_v22, %v1565_v40 }
 0x1e3   :  { %v1600_v62 = vpop.f32.mrf.mxu3  ;;  %2358 = vtanh.f32 %v1597_v12  ;;  %v2174_v29 = vrot.slane %v2173_v63, 4 }
 0x1e4   :  { %v1496_v51 = vpop.f32.mrf.mxu0  ;;  %v1528_v17 = vpop.f32.mrf.mxu1 }
 0x1e5   :  { %v1497_v46 = vadd.f32 %v1496_v51, %v1459_v47  ;;  %v1529_v13 = vadd.f32 %v1528_v17, %v1492_v3  ;;  %v2175_v10 = vadd.f32 %v2174_v29, %v2173_v63 }
 0x1e6   :  { %v1568_v28 = vpop.f32.mrf.mxu2 }
 0x1e7   :  { %v1569_v7 = vadd.f32 %v1568_v28, %v1529_v13  ;;  %v2176_v8 = vrot.slane %v2175_v10, 2 }
 0x1e9   :  { %v1601_v6 = vadd.f32 %v1600_v62, %v1569_v7  ;;  %v2359_v11 = vpop.eup %2358  ;;  %v2177_v38 = vadd.f32 %v2176_v8, %v2175_v10 }
 0x1ea   :  { %v2116_v34 = vmul.f32 %v2359_v11, %v2950_v58 }
 0x1eb   :  { %v1604_v1 = vpop.f32.mrf.mxu3  ;;  %2360 = vtanh.f32 %v1601_v6  ;;  %v2178_v32 = vrot.slane %v2177_v38, 1 }
 0x1ec   :  { %v1632_v4 = vpop.f32.mrf.mxu0  ;;  %v1534_v18 = vpop.f32.mrf.mxu1 }
 0x1ed   :  { %v1535_v20 = vadd.f32 %v1534_v18, %v1497_v46  ;;  %v2179_v21 = vadd.f32 %v2178_v32, %v2177_v38  ;;  %v1633_v13 = vadd.f32 %v1632_v4, %v2852_v19 }
 0x1ee   :  { %v1572_v27 = vpop.f32.mrf.mxu2 }
 0x1ef   :  { %v1573_v55 = vadd.f32 %v1572_v27, %v1535_v20  ;;  %v2213_v33 = vadd.f32 %v3066_v31, %v2179_v21 }
 0x1f1   :  { %v2361_v30 = vpop.eup %2360  ;;  %v1605_v0 = vadd.f32 %v1604_v1, %v1573_v55  ;;  %v2228_v63 = vrot.slane %v2213_v33, 4 }
 0x1f2   :  { %v2124_v49 = vmul.f32 %v2361_v30, %v2953_v59 }
 0x1f3   :  { %v1756_v43 = vpop.f32.mrf.mxu3  ;;  %2362 = vtanh.f32 %v1605_v0 }
 0x1f4   :  { %v1640_v37 = vpop.f32.mrf.mxu0  ;;  %v2180_v9 = vadd.f32 %v2124_v49, %v2116_v34  ;;  %v1684_v36 = vpop.f32.mrf.mxu1 }
 0x1f5   :  { %v1641_v17 = vadd.f32 %v1640_v37, %v2864_v48  ;;  %v1685_v27 = vadd.f32 %v1684_v36, %v1633_v13 }
 0x1f6   :  { %v1720_v41 = vpop.f32.mrf.mxu2 }
 0x1f7   :  { %v1721_v29 = vadd.f32 %v1720_v41, %v1685_v27 }
 0x1f9   :  { %v2363_v16 = vpop.eup %2362 }
 0x1fa   :  { %v2132_v45 = vmul.f32 %v2363_v16, %v2980_v44  ;;  %v1757_v16 = vadd.f32 %v1756_v43, %v1721_v29 }
 0x1fb   :  { %v1762_v25 = vpop.f32.mrf.mxu3 }
 0x1fc   :  { %v1648_v5 = vpop.f32.mrf.mxu0  ;;  %v2181_v42 = vsel %vm178_vm1, %v2132_v45, 0.0  ;;  %v1688_v50 = vpop.f32.mrf.mxu1 }
 0x1fd   :  { %v2182_v61 = vadd.f32 %v2181_v42, %v2180_v9  ;;  %v1649_v51 = vadd.f32 %v1648_v5, %v2872_v54  ;;  %v1689_v18 = vadd.f32 %v1688_v50, %v1641_v17 }
 0x1fe   :  { %v1725_v53 = vpop.f32.mrf.mxu2 }
 0x1ff   :  { %v2183_v57 = vrot.slane %v2182_v61, 4  ;;  %v1726_v55 = vadd.f32 %v1725_v53, %v1689_v18 }
 0x201   :  { %v2184_v24 = vadd.f32 %v2183_v57, %v2182_v61  ;;  %v1763_v9 = vadd.f32 %v1762_v25, %v1726_v55 }
 0x203   :  { %v1768_v60 = vpop.f32.mrf.mxu3  ;;  %v2185_v52 = vrot.slane %v2184_v24, 2 }
 0x204   :  { %v1798_v23 = vpop.f32.mrf.mxu0  ;;  %v1692_v47 = vpop.f32.mrf.mxu1 }
 0x205   :  { %v2186_v22 = vadd.f32 %v2185_v52, %v2184_v24  ;;  %v1693_v1 = vadd.f32 %v1692_v47, %v1649_v51  ;;  %v1799_v4 = vadd.f32 %v1798_v23, %v1757_v16 }
 0x206   :  { %v1730_v56 = vpop.f32.mrf.mxu2 }
 0x207   :  { %v2187_v3 = vrot.slane %v2186_v22, 1  ;;  %v1731_v20 = vadd.f32 %v1730_v56, %v1693_v1 }
 0x209   :  { %v2188_v39 = vadd.f32 %v2187_v3, %v2186_v22  ;;  %v1769_v49 = vadd.f32 %v1768_v60, %v1731_v20 }
 0x20b   :  { %v1918_v15 = vpop.f32.mrf.mxu3  ;;  %v2214_v26 = vadd.f32 %v3066_v31, %v2188_v39 }
 0x20c   :  { %v1802_v35 = vpop.f32.mrf.mxu0  ;;  %v1830_v40 = vpop.f32.mrf.mxu1 }
 0x20d   :  { %v2229_v12 = vrot.slane %v2214_v26, 3  ;;  %v1803_v37 = vadd.f32 %v1802_v35, %v1763_v9  ;;  %v1831_v42 = vadd.f32 %v1830_v40, %v1799_v4 }
 0x20e   :  { %v1866_v14 = vpop.f32.mrf.mxu2 }
 0x20f   :  { %v3135_v62 = vsel %vm2238_vm5, %v2228_v63, %v2229_v12  ;;  %v1867_v50 = vadd.f32 %v1866_v14, %v2852_v19 }
 0x211   :  { %v1919_v61 = vadd.f32 %v1918_v15, %v1867_v50 }
 0x213   :  { %v1922_v46 = vpop.f32.mrf.mxu3 }
 0x214   :  { %v1806_v28 = vpop.f32.mrf.mxu0  ;;  %v1834_v7 = vpop.f32.mrf.mxu1 }
 0x215   :  { %v1807_v10 = vadd.f32 %v1806_v28, %v1769_v49  ;;  %v1835_v5 = vadd.f32 %v1834_v7, %v1803_v37 }
 0x216   :  { %v1874_v6 = vpop.f32.mrf.mxu2 }
 0x217   :  { %v1875_v53 = vadd.f32 %v1874_v6, %v2864_v48 }
 0x219   :  { %v1923_v25 = vadd.f32 %v1922_v46, %v1875_v53 }
 0x21b   :  { %v1926_v11 = vpop.f32.mrf.mxu3 }
 0x21c   :  { %v1954_v30 = vpop.f32.mrf.mxu0  ;;  %v1838_v0 = vpop.f32.mrf.mxu1 }
 0x21d   :  { %v1839_v8 = vadd.f32 %v1838_v0, %v1807_v10  ;;  %v1955_v57 = vadd.f32 %v1954_v30, %v1919_v61 }
 0x21e   :  { %v1882_v34 = vpop.f32.mrf.mxu2 }
 0x21f   :  { %2364 = vtanh.f32 %v1839_v8  ;;  %v1883_v19 = vadd.f32 %v1882_v34, %v2872_v54 }
 0x220   :  { %2366 = vtanh.f32 %v1835_v5 }
 0x221   :  { %2368 = vtanh.f32 %v1831_v42  ;;  %v1927_v35 = vadd.f32 %v1926_v11, %v1883_v19 }
 0x223   :  { %v2064_v45 = vpop.f32.mrf.mxu3 }
 0x224   :  { %v1990_v36 = vpop.f32.mrf.mxu1  ;;  %v1959_v41 = vpop.f32.mrf.mxu0 }
 0x225   :  { %v2365_v43 = vpop.eup %2364  ;;  %v1960_v32 = vadd.f32 %v1959_v41, %v1923_v25  ;;  %v1991_v23 = vadd.f32 %v1990_v36, %v1955_v57 }
 0x226   :  { %v2032_v38 = vpop.f32.mrf.mxu2  ;;  %v2367_v60 = vpop.eup %2366  ;;  %v2133_v48 = vmul.f32 %v2365_v43, %v2980_v44 }
 0x227   :  { %v2369_v22 = vpop.eup %2368  ;;  %v2125_v21 = vmul.f32 %v2367_v60, %v2953_v59  ;;  %v2033_v39 = vadd.f32 %v2032_v38, %v1991_v23 }
 0x228   :  { %v2117_v33 = vmul.f32 %v2369_v22, %v2950_v58  ;;  %v2190_v26 = vsel %vm178_vm1, %v2133_v48, 0.0 }
 0x229   :  { %v2065_v12 = vadd.f32 %v2064_v45, %v2033_v39 }
 0x22a   :  { %v2189_v14 = vadd.f32 %v2125_v21, %v2117_v33 }
 0x22b   :  { %v2068_v24 = vpop.f32.mrf.mxu3 }
 0x22c   :  { %v1996_v52 = vpop.f32.mrf.mxu1  ;;  %v1964_v15 = vpop.f32.mrf.mxu0  ;;  %v2191_v46 = vadd.f32 %v2190_v26, %v2189_v14 }
 0x22d   :  { %v1997_v56 = vadd.f32 %v1996_v52, %v1960_v32  ;;  %v1965_v63 = vadd.f32 %v1964_v15, %v1927_v35 }
 0x22e   :  { %v2036_v47 = vpop.f32.mrf.mxu2  ;;  %v2192_v7 = vrot.slane %v2191_v46, 4 }
 0x22f   :  { %v2037_v3 = vadd.f32 %v2036_v47, %v1997_v56 }
 0x230   :  { %v2193_v18 = vadd.f32 %v2192_v7, %v2191_v46 }
 0x231   :  { %v2069_v40 = vadd.f32 %v2068_v24, %v2037_v3 }
 0x232   :  { %v2194_v55 = vrot.slane %v2193_v18, 2 }
 0x233   :  { %2370 = vtanh.f32 %v2069_v40  ;;  %v2072_v28 = vpop.f32.mrf.mxu3 }
 0x234   :  { %v2002_v51 = vpop.f32.mrf.mxu1  ;;  %2372 = vtanh.f32 %v2065_v12  ;;  %v2195_v49 = vadd.f32 %v2194_v55, %v2193_v18 }
 0x235   :  { %v2003_v17 = vadd.f32 %v2002_v51, %v1965_v63 }
 0x236   :  { %v2040_v54 = vpop.f32.mrf.mxu2  ;;  %v2196_v16 = vrot.slane %v2195_v49, 1 }
 0x237   :  { %v2041_v13 = vadd.f32 %v2040_v54, %v2003_v17 }
 0x238   :  { %v2197_v4 = vadd.f32 %v2196_v16, %v2195_v49 }
 0x239   :  { %v2073_v6 = vadd.f32 %v2072_v28, %v2041_v13  ;;  %v2371_v1 = vpop.eup %2370 }
 0x23a   :  { %v2373_v27 = vpop.eup %2372  ;;  %v2126_v20 = vmul.f32 %v2371_v1, %v2953_v59  ;;  %v2215_v59 = vadd.f32 %v3066_v31, %v2197_v4 }
 0x23b   :  { %2374 = vtanh.f32 %v2073_v6  ;;  %v2118_v30 = vmul.f32 %v2373_v27, %v2950_v58 }
 0x23c   :  { %v2230_v58 = vrot.slane %v2215_v59, 2 }
 0x23d   :  { %v2198_v0 = vadd.f32 %v2126_v20, %v2118_v30 }
 0x241   :  { %v2375_v11 = vpop.eup %2374 }
 0x242   :  { %v2134_v29 = vmul.f32 %v2375_v11, %v2980_v44 }
 0x244   :  { %v2199_v34 = vsel %vm178_vm1, %v2134_v29, 0.0 }
 0x245   :  { %v2200_v9 = vadd.f32 %v2199_v34, %v2198_v0 }
 0x247   :  { %v2201_v10 = vrot.slane %v2200_v9, 4 }
 0x249   :  { %v2202_v37 = vadd.f32 %v2201_v10, %v2200_v9 }
 0x24b   :  { %v2203_v8 = vrot.slane %v2202_v37, 2 }
 0x24d   :  { %v2204_v45 = vadd.f32 %v2203_v8, %v2202_v37 }
 0x24f   :  { %v2205_v5 = vrot.slane %v2204_v45, 1 }
 0x251   :  { %v2206_v42 = vadd.f32 %v2205_v5, %v2204_v45 }
 0x253   :  { %v2216_v50 = vadd.f32 %v3066_v31, %v2206_v42 }
 0x255   :  { %v2231_v44 = vrot.slane %v2216_v50, 1 }
 0x257   :  { %v2241_v36 = vsel %vm2240_vm6, %v2230_v58, %v2231_v44 }
 0x258   :  { %v2243_v38 = vsel %vm2242_vm7, %v3135_v62, %v2241_v36 }
 0x259   :  { %v2244_v53 = vsel %vm178_vm1, %v3121_v2, %v2243_v38 }
 0x25a   :  { %2246 = vst [vmem:[#allocation6] sm:$0xff] %v2244_v53 }
 0x25b   :  { %2257 = dma.vmem_to_hbm [thread:$0]  %s2253_s5, 128, %s2255_s8, [#allocation5]  }
 0x25c   :  { %2426 = dma.done.wait [#allocation5], 128  }
 0x25d   :  { %2427 = vsyncadd [#allocation5], 4294967168 }
 0x25e   :  { %2262 = vsyncpa [#allocation4], 1 }
 0x25f   :  { %2263 = vsyncpa [#allocation5], 1 }

</bundles_post_ra>
